<compile_context>
chip_gen: v6e
topology: v6e:2x2x1
jax: 0.10.0
libtpu: 0.0.40
codegen_flags: <defaults>
</compile_context>

<pallas_src>
import jax
import jax.numpy as jnp
from jax import lax
from jax.experimental import pallas as pl
from jax.experimental.pallas import tpu as pltpu

LANE = 128


# ----------------------------------------------------------------------------
# BatchNorm (eval) folding helper:  BN(conv(x)+bias) == conv(x)*scale + shift
# ----------------------------------------------------------------------------
def fold_bn(gamma, beta, mean, var, eps, conv_bias=None):
    scale = gamma / jnp.sqrt(var + eps)
    bias = conv_bias if conv_bias is not None else jnp.zeros_like(mean)
    shift = (bias - mean) * scale + beta
    return scale[None, :].astype(jnp.float32), shift[None, :].astype(jnp.float32)


def _pad_cols(a, n):
    return a if a.shape[-1] == n else jnp.pad(a, ((0, 0), (0, n - a.shape[-1])))


def _pick_tile_h(h, target):
    th = min(int(target), h)
    while h % th:
        th -= 1
    return th


# ----------------------------------------------------------------------------
# Pallas kernel 1: fused point head
#   sh_layers : Linear(256->F,no bias)->BN->ReLU -> Linear(F->(MAX_SH+1)^2,bias)
#   gaus_layers: Linear(256->256)->BN->ReLU -> Linear(256->128)->BN->ReLU
#                -> Linear(128->1,bias) -> sigmoid
# Both heads share the same pw_features tile (one DMA).  Final outputs are
# lane-padded to 128 so stores are full-lane (sliced back outside).
# ----------------------------------------------------------------------------
def _point_head_kernel(x_ref, w1_ref, s1_ref, t1_ref, w2_ref, b2_ref,
                       g1_ref, gs1_ref, gt1_ref, g2_ref, gs2_ref, gt2_ref,
                       g3_ref, gb3_ref, sh_ref, gaus_ref):
    x = x_ref[...]                                               # (TM, 256) bf16
    # ---- sh head ----
    h = jnp.dot(x, w1_ref[...], preferred_element_type=jnp.float32)
    h = jnp.maximum(h * s1_ref[...] + t1_ref[...], 0.0)          # folded BN + ReLU
    sh_ref[...] = (jnp.dot(h.astype(w2_ref.dtype), w2_ref[...],
                           preferred_element_type=jnp.float32) + b2_ref[...])
    # ---- gaus head ----
    g = jnp.dot(x, g1_ref[...], preferred_element_type=jnp.float32)
    g = jnp.maximum(g * gs1_ref[...] + gt1_ref[...], 0.0)
    g = jnp.dot(g.astype(g2_ref.dtype), g2_ref[...],
                preferred_element_type=jnp.float32)
    g = jnp.maximum(g * gs2_ref[...] + gt2_ref[...], 0.0)
    g = (jnp.dot(g.astype(g3_ref.dtype), g3_ref[...],
                 preferred_element_type=jnp.float32) + gb3_ref[...])
    gaus_ref[...] = 1.0 / (1.0 + jnp.exp(-g))                    # sigmoid


def point_head(pw_features, p, sh_dim, *, tile_m=256):
    M, Cin = pw_features.shape
    TM = int(tile_m)
    Mp = pl.cdiv(M, TM) * TM
    x = pw_features.astype(jnp.bfloat16)
    if Mp != M:
        x = jnp.pad(x, ((0, Mp - M), (0, 0)))

    bf = jnp.bfloat16
    w1 = p['sh_w1'].astype(bf)
    s1 = p['sh_s1'].astype(jnp.float32)
    t1 = p['sh_t1'].astype(jnp.float32)
    Dsh = pl.cdiv(p['sh_w2'].shape[1], LANE) * LANE              # lane-dense output
    w2 = _pad_cols(p['sh_w2'], Dsh).astype(bf)
    b2 = _pad_cols(p['sh_b2'], Dsh).astype(jnp.float32)
    g1 = p['gaus_w1'].astype(bf)
    gs1 = p['gaus_s1'].astype(jnp.float32)
    gt1 = p['gaus_t1'].astype(jnp.float32)
    g2 = p['gaus_w2'].astype(bf)
    gs2 = p['gaus_s2'].astype(jnp.float32)
    gt2 = p['gaus_t2'].astype(jnp.float32)
    Dg = LANE
    g3 = _pad_cols(p['gaus_w3'], Dg).astype(bf)
    gb3 = _pad_cols(p['gaus_b3'], Dg).astype(jnp.float32)

    F, G1, G2 = w1.shape[1], g1.shape[1], g2.shape[1]
    flops = 2 * Mp * (Cin * F + F * Dsh + Cin * G1 + G1 * G2 + G2 * Dg)
    bytes_accessed = int(x.nbytes + w1.nbytes + w2.nbytes + g1.nbytes
                         + g2.nbytes + g3.nbytes + Mp * (Dsh + Dg) * 4)

    const = lambda i: (0, 0)
    row = lambda i: (i, 0)
    sh, gaus = pl.pallas_call(
        _point_head_kernel,
        out_shape=(jax.ShapeDtypeStruct((Mp, Dsh), jnp.float32),
                   jax.ShapeDtypeStruct((Mp, Dg), jnp.float32)),
        grid=(Mp // TM,),
        in_specs=[
            pl.BlockSpec((TM, Cin), row),
            pl.BlockSpec(w1.shape, const), pl.BlockSpec(s1.shape, const),
            pl.BlockSpec(t1.shape, const), pl.BlockSpec(w2.shape, const),
            pl.BlockSpec(b2.shape, const),
            pl.BlockSpec(g1.shape, const), pl.BlockSpec(gs1.shape, const),
            pl.BlockSpec(gt1.shape, const), pl.BlockSpec(g2.shape, const),
            pl.BlockSpec(gs2.shape, const), pl.BlockSpec(gt2.shape, const),
            pl.BlockSpec(g3.shape, const), pl.BlockSpec(gb3.shape, const),
        ],
        out_specs=(pl.BlockSpec((TM, Dsh), row), pl.BlockSpec((TM, Dg), row)),
        compiler_params=pltpu.CompilerParams(
            dimension_semantics=("parallel",),
            vmem_limit_bytes=32 * 1024 * 1024),
        cost_estimate=pl.CostEstimate(flops=int(flops),
                                      transcendentals=int(Mp * Dg),
                                      bytes_accessed=bytes_accessed),
    )(x, w1, s1, t1, w2, b2, g1, gs1, gt1, g2, gs2, gt2, g3, gb3)
    return sh[:M, :sh_dim], gaus[:M, :1]


# ----------------------------------------------------------------------------
# Pallas kernel 2: 3x3 conv (pad=1, stride=1) + folded BN(+bias) + ReLU
#                  + fused occupancy-mask multiply.
# Spatially tiled: grid = (B, H // TH); the 1-row halos above/below each tile
# come in as tiny side inputs (built from strided slices outside, no full pad).
# The kx neighbourhood is folded into K = 3*C via row-shifted reads from a
# VMEM scratch slab (no per-tap strided window copies).
# ----------------------------------------------------------------------------
def _conv3x3_bn_relu_mask_kernel(x_ref, up_ref, dn_ref, m_ref, w_ref,
                                 s_ref, t_ref, o_ref, xs_ref):
    # x_ref : (1, 1, TH, W, C)   feature tile (image rows i*TH .. i*TH+TH-1)
    # up_ref: (1, 1, W, C)       halo row i*TH-1   (zeros at the image top)
    # dn_ref: (1, 1, W, C)       halo row (i+1)*TH (zeros at the image bottom)
    # m_ref : (1, 1, TH, W, 1)   f32 occupancy mask of the output tile
    # w_ref : (3, 3*C, Cout)     taps, (ky, kx*C + c) row-major
    # s_ref, t_ref: (1, Cout)    folded BN scale / shift(+bias), f32
    # o_ref : (1, 1, TH, W, Cout)
    # xs_ref: VMEM scratch ((TH+2)*W + 32, C)
    TH, W, C = x_ref.shape[2], x_ref.shape[3], x_ref.shape[4]
    Cout = o_ref.shape[4]
    N = (TH + 2) * W              # rows of the halo'd slab, row k <-> (k//W, k%W)
    OFF = 16                      # aligned base row inside the scratch slab

    # Assemble the halo'd slab in scratch (flattened (row, col) -> row*W + col).
    xs_ref[OFF:OFF + W, :] = up_ref[0, 0]
    xs_ref[OFF + W:OFF + (TH + 1) * W, :] = x_ref[0, 0].reshape(TH * W, C)
    xs_ref[OFF + (TH + 1) * W:OFF + N, :] = dn_ref[0, 0]

    # im2col over kx: stack the (w-1, w, w+1) neighbours along channels (K=3*C).
    # The +-1 shifted reads realise the column shift; wrapped columns (which
    # correspond to the zero W-padding of the conv) are masked to zero.
    center = xs_ref[OFF:OFF + N, :]
    left = xs_ref[OFF - 1:OFF - 1 + N, :]        # row k -> x[.., w-1, :]
    right = xs_ref[OFF + 1:OFF + 1 + N, :]       # row k -> x[.., w+1, :]
    wcol = lax.broadcasted_iota(jnp.int32, (N, 1), 0) % W
    left = jnp.where(wcol != 0, left, 0).astype(center.dtype)
    right = jnp.where(wcol != W - 1, right, 0).astype(center.dtype)
    xcat = jnp.concatenate([left, center, right], axis=-1)       # (N, 3*C)

    acc = jnp.zeros((TH * W, Cout), jnp.float32)
    for ky in range(3):                                          # 3 MXU matmuls, K = 3*C
        acc = acc + jnp.dot(xcat[ky * W:(ky + TH) * W, :], w_ref[ky],
                            preferred_element_type=jnp.float32)

    y = jnp.maximum(acc * s_ref[...] + t_ref[...], 0.0)          # folded BN + ReLU (f32)
    y = y * m_ref[0, 0].reshape(TH * W, 1)                       # sparse active-set mask
    o_ref[...] = y.reshape(o_ref.shape).astype(o_ref.dtype)


def conv3x3_bn_relu_masked(x_nhwc, mask, w_hwio, scale, shift, *,
                           tile_h=16, out_dtype=None):
    """x_nhwc: (B,H,W,C) features; mask: (B,H,W,1) f32 active-set mask (fused)."""
    B, H, W, C = x_nhwc.shape
    Cout = w_hwio.shape[-1]
    out_dtype = out_dtype or x_nhwc.dtype
    cdt = x_nhwc.dtype
    # Tile H.  NOTE: tune `tile_h` per TPU generation (v7x has 64 MiB VMEM ->
    # keep TH <= 16; v5e/v6e can go larger).  32 MiB scoped VMEM fits all gens.
    TH = _pick_tile_h(H, tile_h)
    nH = H // TH

    x5 = x_nhwc.reshape(B, nH, TH, W, C)
    m5 = mask.astype(jnp.float32).reshape(B, nH, TH, W, 1)
    zrow = jnp.zeros((B, 1, W, C), cdt)
    # Halo rows i*TH-1 / (i+1)*TH per tile — tiny strided gathers, no full pad.
    up = jnp.concatenate([zrow, x5[:, :-1, TH - 1]], axis=1)     # (B, nH, W, C)
    dn = jnp.concatenate([x5[:, 1:, 0], zrow], axis=1)           # (B, nH, W, C)
    w3 = w_hwio.astype(cdt).reshape(3, 3 * C, Cout)
    s2 = scale.astype(jnp.float32).reshape(1, Cout)
    t2 = shift.astype(jnp.float32).reshape(1, Cout)

    flops = 2 * 9 * B * H * W * C * Cout
    bytes_accessed = int(x5.nbytes + up.nbytes + dn.nbytes + m5.nbytes + w3.nbytes
                         + B * H * W * Cout * jnp.dtype(out_dtype).itemsize)

    y = pl.pallas_call(
        _conv3x3_bn_relu_mask_kernel,
        out_shape=jax.ShapeDtypeStruct((B, nH, TH, W, Cout), out_dtype),
        grid=(B, nH),
        in_specs=[
            pl.BlockSpec((1, 1, TH, W, C), lambda b, i: (b, i, 0, 0, 0)),
            pl.BlockSpec((1, 1, W, C), lambda b, i: (b, i, 0, 0)),
            pl.BlockSpec((1, 1, W, C), lambda b, i: (b, i, 0, 0)),
            pl.BlockSpec((1, 1, TH, W, 1), lambda b, i: (b, i, 0, 0, 0)),
            pl.BlockSpec((3, 3 * C, Cout), lambda b, i: (0, 0, 0)),
            pl.BlockSpec((1, Cout), lambda b, i: (0, 0)),
            pl.BlockSpec((1, Cout), lambda b, i: (0, 0)),
        ],
        out_specs=pl.BlockSpec((1, 1, TH, W, Cout), lambda b, i: (b, i, 0, 0, 0)),
        scratch_shapes=[pltpu.VMEM(((TH + 2) * W + 32, C), cdt)],
        compiler_params=pltpu.CompilerParams(
            dimension_semantics=("parallel", "parallel"),
            vmem_limit_bytes=32 * 1024 * 1024),
        cost_estimate=pl.CostEstimate(flops=int(flops), transcendentals=0,
                                      bytes_accessed=bytes_accessed),
    )(x5, up, dn, m5, w3, s2, t2)
    return y.reshape(B, H, W, Cout)


# ----------------------------------------------------------------------------
# Forward pass (XLA glue + Pallas kernels)
# ----------------------------------------------------------------------------
def point_expand_voxel3_forward(batch_dict, params, cfg, *, debug_nan_checks=False):
    B = batch_dict['batch_size']
    H, W = cfg['spatial_shape']
    C = cfg['shared_conv_channel']
    M = cfg['num_voxels']
    sh_dim = cfg['sh_dim']
    tile_h = cfg.get('tile_h', 16)

    # ins_features: [B, Cpt, N] -> permute(0, 2, 1) -> view(-1, Cpt)
    feats = batch_dict['encoder_features'][4]
    Bf, Cpt, N = feats.shape
    ins_features = jnp.transpose(feats, (0, 2, 1)).reshape(Bf * N, Cpt)
    if debug_nan_checks:  # host-sync check removed from the hot path (perf review)
        assert not bool(jnp.isnan(ins_features).sum())

    # al_utils.pool_feature_in_same_voxel: mean-pool point features per voxel.
    # TODO(synk): exact al_utils semantics unavailable; pooling uses precomputed
    # point->voxel segment ids (scatter glue; hot matmul/conv paths are Pallas).
    seg_ids = batch_dict['encoder_coords'][4]
    sums = jax.ops.segment_sum(ins_features, seg_ids, num_segments=M)
    cnts = jax.ops.segment_sum(jnp.ones((ins_features.shape[0],), jnp.float32),
                               seg_ids, num_segments=M)
    pw_features = sums / jnp.maximum(cnts, 1.0)[:, None]
    if debug_nan_checks:
        assert not bool(jnp.isnan(pw_features).sum())

    # sh_layers + gaus_layers (fused Pallas point-head kernel)
    pred_sh, pred_gaus = point_head(pw_features, params, sh_dim)

    # al_utils.get_sparse_voxel_feature3:
    # TODO(synk): source unavailable; stand-in = deterministic linear projection
    # of concat(pw_features, sh_features, gaus_features) to SHARED_CONV_CHANNEL.
    sp_in = jnp.concatenate([pw_features, pred_sh, pred_gaus], axis=-1)
    sp_features = sp_in @ params['w_proj']                       # (M, C)
    voxel_coords = batch_dict['voxel_coords']                    # (M, 3) = (b, y, x)

    # Densify the sparse voxel tensor -> bf16 NHWC grid + f32 occupancy mask.
    b_i, y_i, x_i = voxel_coords[:, 0], voxel_coords[:, 1], voxel_coords[:, 2]
    dense = jnp.zeros((B, H, W, C), jnp.bfloat16).at[b_i, y_i, x_i].set(
        sp_features.astype(jnp.bfloat16))
    mask = jnp.zeros((B, H, W, 1), jnp.float32).at[b_i, y_i, x_i].set(1.0)
    # SparseConv2d dilates the active set by its 3x3 footprint (C=1, tiny).
    mask1 = lax.reduce_window(mask, 0.0, lax.max,
                              (1, 3, 3, 1), (1, 1, 1, 1), 'SAME')

    # conv_out: SparseConv2d(C,C,3,p=1,bias=False) + BN(eps=1e-3) + ReLU
    # (occupancy mask fused in-kernel, applied before y1 is written)
    y1 = conv3x3_bn_relu_masked(dense, mask1, params['conv1_w'],
                                params['conv1_scale'], params['conv1_shift'],
                                tile_h=tile_h, out_dtype=jnp.bfloat16)
    # shared_conv: SubMConv2d(C,C,3,p=1,bias=True) + BN + ReLU on the dilated set
    y2 = conv3x3_bn_relu_masked(y1, mask1, params['conv2_w'],
                                params['conv2_scale'], params['conv2_shift'],
                                tile_h=tile_h, out_dtype=jnp.float32)

    batch_dict['encoded_spconv_tensor'] = (y2, mask1)
    return batch_dict


# ----------------------------------------------------------------------------
# Demo + self-checks
# ----------------------------------------------------------------------------
if __name__ == "__main__":
    key = jax.random.PRNGKey(0)
    keys = jax.random.split(key, 20)

    # Small shapes consistent with the module (production: 256-dim point
    # features, SHARED_CONV_CHANNEL=128, spatial [200, 176] — spatial shrunk).
    B, N, Cpt = 2, 128, 256
    H, W = 32, 32               # exercises H-tiling: TH=16 -> 2 tiles per image
    C = 128                     # SHARED_CONV_CHANNEL (production, lane-dense)
    SH_FC = (128,)
    MAX_SH = 2
    SH_DIM = (MAX_SH + 1) ** 2  # 9
    M = 64                      # number of occupied voxels

    feats = jax.random.normal(keys[0], (B, Cpt, N), jnp.float32)
    seg_ids = jax.random.randint(keys[1], (B * N,), 0, M, jnp.int32)
    vb = (jnp.arange(M) % B).astype(jnp.int32)
    vy = jax.random.randint(keys[2], (M,), 0, H, jnp.int32)
    vx = jax.random.randint(keys[3], (M,), 0, W, jnp.int32)
    voxel_coords = jnp.stack([vb, vy, vx], axis=-1)

    def bn_params(k, c):
        k1, k2, k3, k4 = jax.random.split(k, 4)
        gamma = 1.0 + 0.1 * jax.random.normal(k1, (c,), jnp.float32)
        beta = 0.1 * jax.random.normal(k2, (c,), jnp.float32)
        mean = 0.1 * jax.random.normal(k3, (c,), jnp.float32)
        var = 1.0 + 0.1 * jax.random.uniform(k4, (c,), jnp.float32)
        return gamma, beta, mean, var

    F = SH_FC[0]
    sh_w1 = 0.02 * jax.random.normal(keys[4], (Cpt, F), jnp.float32)
    sh_s1, sh_t1 = fold_bn(*bn_params(keys[5], F), eps=1e-5)
    sh_w2 = 0.02 * jax.random.normal(keys[6], (F, SH_DIM), jnp.float32)
    sh_b2 = 0.01 * jax.random.normal(keys[7], (1, SH_DIM), jnp.float32)

    gaus_w1 = 0.02 * jax.random.normal(keys[8], (Cpt, 256), jnp.float32)
    gaus_s1, gaus_t1 = fold_bn(*bn_params(keys[9], 256), eps=1e-5)
    gaus_w2 = 0.02 * jax.random.normal(keys[10], (256, 128), jnp.float32)
    gaus_s2, gaus_t2 = fold_bn(*bn_params(keys[11], 128), eps=1e-5)
    gaus_w3 = 0.02 * jax.random.normal(keys[12], (128, 1), jnp.float32)
    gaus_b3 = 0.01 * jax.random.normal(keys[13], (1, 1), jnp.float32)

    w_proj = 0.02 * jax.random.normal(keys[14], (Cpt + SH_DIM + 1, C), jnp.float32)

    conv1_w = 0.05 * jax.random.normal(keys[15], (3, 3, C, C), jnp.float32)
    conv1_scale, conv1_shift = fold_bn(*bn_params(keys[16], C), eps=1e-3)

    conv2_w = 0.05 * jax.random.normal(keys[17], (3, 3, C, C), jnp.float32)
    conv2_bias = 0.01 * jax.random.normal(keys[18], (C,), jnp.float32)
    conv2_scale, conv2_shift = fold_bn(*bn_params(keys[19], C), eps=1e-5,
                                       conv_bias=conv2_bias)

    params = dict(
        sh_w1=sh_w1, sh_s1=sh_s1, sh_t1=sh_t1, sh_w2=sh_w2, sh_b2=sh_b2,
        gaus_w1=gaus_w1, gaus_s1=gaus_s1, gaus_t1=gaus_t1,
        gaus_w2=gaus_w2, gaus_s2=gaus_s2, gaus_t2=gaus_t2,
        gaus_w3=gaus_w3, gaus_b3=gaus_b3,
        w_proj=w_proj,
        conv1_w=conv1_w, conv1_scale=conv1_scale, conv1_shift=conv1_shift,
        conv2_w=conv2_w, conv2_scale=conv2_scale, conv2_shift=conv2_shift,
    )
    cfg = dict(spatial_shape=(H, W), shared_conv_channel=C, num_voxels=M,
               sh_dim=SH_DIM, tile_h=16)

    batch_dict = {
        'batch_size': B,
        'encoder_features': {4: feats},
        'encoder_coords': {4: seg_ids},
        'voxel_coords': voxel_coords,
    }

    out = point_expand_voxel3_forward(batch_dict, params, cfg)
    y2, mask1 = out['encoded_spconv_tensor']
    jax.block_until_ready(y2)
    assert y2.shape == (B, H, W, C)
    assert not bool(jnp.isnan(y2).any())

    # --- self-check: tiled conv kernel vs plain-JAX reference (bf16 inputs) ---
    xx = (0.5 * jax.random.normal(keys[0], (B, H, W, C), jnp.float32)).astype(jnp.bfloat16)
    mm = (jax.random.uniform(keys[1], (B, H, W, 1)) > 0.5).astype(jnp.float32)
    yk = conv3x3_bn_relu_masked(xx, mm, conv1_w, conv1_scale, conv1_shift,
                                tile_h=16, out_dtype=jnp.float32)
    yr = lax.conv_general_dilated(
        xx.astype(jnp.float32),
        conv1_w.astype(jnp.bfloat16).astype(jnp.float32),
        (1, 1), 'SAME', dimension_numbers=('NHWC', 'HWIO', 'NHWC'))
    yr = jnp.maximum(yr * conv1_scale.reshape(1, 1, 1, C)
                     + conv1_shift.reshape(1, 1, 1, C), 0.0) * mm
    assert bool(jnp.allclose(yk, yr, atol=5e-2, rtol=5e-2))

    # --- self-check: fused point-head kernel vs plain-JAX reference ---
    def _bf(a):
        return a.astype(jnp.bfloat16).astype(jnp.float32)

    pw_t = jax.random.normal(keys[2], (M, Cpt), jnp.float32)
    sh_k, gaus_k = point_head(pw_t, params, SH_DIM, tile_m=128)
    xb = _bf(pw_t)
    h_r = jnp.maximum((xb @ _bf(sh_w1)) * sh_s1 + sh_t1, 0.0)
    sh_r = _bf(h_r) @ _bf(sh_w2) + sh_b2
    g_r = jnp.maximum((xb @ _bf(gaus_w1)) * gaus_s1 + gaus_t1, 0.0)
    g_r = jnp.maximum((_bf(g_r) @ _bf(gaus_w2)) * gaus_s2 + gaus_t2, 0.0)
    g_r = _bf(g_r) @ _bf(gaus_w3) + gaus_b3
    gaus_r = 1.0 / (1.0 + jnp.exp(-g_r))
    assert bool(jnp.allclose(sh_k, sh_r, atol=5e-2, rtol=5e-2))
    assert bool(jnp.allclose(gaus_k, gaus_r, atol=5e-2, rtol=5e-2))

    print("KERNEL_OK")
</pallas_src>

<mosaic_0001>
module attributes {stable_mosaic.version = 11 : i64} {
  func.func @_point_head_kernel(%arg0: i32, %arg1: memref<256x256xbf16, #tpu.memory_space<vmem>>, %arg2: memref<256x128xbf16, #tpu.memory_space<vmem>>, %arg3: memref<1x128xf32, #tpu.memory_space<vmem>>, %arg4: memref<1x128xf32, #tpu.memory_space<vmem>>, %arg5: memref<128x128xbf16, #tpu.memory_space<vmem>>, %arg6: memref<1x128xf32, #tpu.memory_space<vmem>>, %arg7: memref<256x256xbf16, #tpu.memory_space<vmem>>, %arg8: memref<1x256xf32, #tpu.memory_space<vmem>>, %arg9: memref<1x256xf32, #tpu.memory_space<vmem>>, %arg10: memref<256x128xbf16, #tpu.memory_space<vmem>>, %arg11: memref<1x128xf32, #tpu.memory_space<vmem>>, %arg12: memref<1x128xf32, #tpu.memory_space<vmem>>, %arg13: memref<128x128xbf16, #tpu.memory_space<vmem>>, %arg14: memref<1x128xf32, #tpu.memory_space<vmem>>, %arg15: memref<256x128xf32, #tpu.memory_space<vmem>>, %arg16: memref<256x128xf32, #tpu.memory_space<vmem>>) attributes {dimension_semantics = [#tpu.dimension_semantics<parallel>], iteration_bounds = array<i64: 1>, scalar_prefetch = 0 : i64, scratch_operands = 0 : i64, tpu.core_type = #tpu.core_type<tc>, window_params = [{transform_indices = @transform_0, window_bounds = array<i64: 256, 256>}, {pipeline_mode = #tpu.pipeline_mode<synchronous>, transform_indices = @transform_1, window_bounds = array<i64: 256, 128>}, {pipeline_mode = #tpu.pipeline_mode<synchronous>, transform_indices = @transform_2, window_bounds = array<i64: 1, 128>}, {pipeline_mode = #tpu.pipeline_mode<synchronous>, transform_indices = @transform_3, window_bounds = array<i64: 1, 128>}, {pipeline_mode = #tpu.pipeline_mode<synchronous>, transform_indices = @transform_4, window_bounds = array<i64: 128, 128>}, {pipeline_mode = #tpu.pipeline_mode<synchronous>, transform_indices = @transform_5, window_bounds = array<i64: 1, 128>}, {pipeline_mode = #tpu.pipeline_mode<synchronous>, transform_indices = @transform_6, window_bounds = array<i64: 256, 256>}, {pipeline_mode = #tpu.pipeline_mode<synchronous>, transform_indices = @transform_7, window_bounds = array<i64: 1, 256>}, {pipeline_mode = #tpu.pipeline_mode<synchronous>, transform_indices = @transform_8, window_bounds = array<i64: 1, 256>}, {pipeline_mode = #tpu.pipeline_mode<synchronous>, transform_indices = @transform_9, window_bounds = array<i64: 256, 128>}, {pipeline_mode = #tpu.pipeline_mode<synchronous>, transform_indices = @transform_10, window_bounds = array<i64: 1, 128>}, {pipeline_mode = #tpu.pipeline_mode<synchronous>, transform_indices = @transform_11, window_bounds = array<i64: 1, 128>}, {pipeline_mode = #tpu.pipeline_mode<synchronous>, transform_indices = @transform_12, window_bounds = array<i64: 128, 128>}, {pipeline_mode = #tpu.pipeline_mode<synchronous>, transform_indices = @transform_13, window_bounds = array<i64: 1, 128>}, {transform_indices = @transform_14, window_bounds = array<i64: 256, 128>}, {transform_indices = @transform_15, window_bounds = array<i64: 256, 128>}]} {
    %c0 = arith.constant 0 : index
    %c0_0 = arith.constant 0 : index
    %0 = vector.load %arg1[%c0, %c0_0] : memref<256x256xbf16, #tpu.memory_space<vmem>>, vector<256x256xbf16>
    %c0_1 = arith.constant 0 : index
    %c0_2 = arith.constant 0 : index
    %1 = vector.load %arg2[%c0_1, %c0_2] : memref<256x128xbf16, #tpu.memory_space<vmem>>, vector<256x128xbf16>
    %cst = arith.constant dense<0.000000e+00> : vector<256x128xf32>
    %2 = tpu.matmul %0, %1, %cst {dimension_numbers = #tpu.dot_dimension_numbers<[1], [0], [0], [1], [0, 0, 1, 1], [], []>} : vector<256x256xbf16>, vector<256x128xbf16>, vector<256x128xf32> -> vector<256x128xf32>
    %c0_3 = arith.constant 0 : index
    %c0_4 = arith.constant 0 : index
    %3 = vector.load %arg3[%c0_3, %c0_4] : memref<1x128xf32, #tpu.memory_space<vmem>>, vector<1x128xf32>
    %4 = vector.broadcast %3 : vector<1x128xf32> to vector<256x128xf32>
    %5 = arith.mulf %2, %4 : vector<256x128xf32>
    %c0_5 = arith.constant 0 : index
    %c0_6 = arith.constant 0 : index
    %6 = vector.load %arg4[%c0_5, %c0_6] : memref<1x128xf32, #tpu.memory_space<vmem>>, vector<1x128xf32>
    %7 = vector.broadcast %6 : vector<1x128xf32> to vector<256x128xf32>
    %8 = arith.addf %5, %7 : vector<256x128xf32>
    %cst_7 = arith.constant 0.000000e+00 : f32
    %9 = vector.broadcast %cst_7 : f32 to vector<256x128xf32>
    %10 = arith.maximumf %8, %9 : vector<256x128xf32>
    %11 = arith.truncf %10 : vector<256x128xf32> to vector<256x128xbf16>
    %c0_8 = arith.constant 0 : index
    %c0_9 = arith.constant 0 : index
    %12 = vector.load %arg5[%c0_8, %c0_9] : memref<128x128xbf16, #tpu.memory_space<vmem>>, vector<128x128xbf16>
    %cst_10 = arith.constant dense<0.000000e+00> : vector<256x128xf32>
    %13 = tpu.matmul %11, %12, %cst_10 {dimension_numbers = #tpu.dot_dimension_numbers<[1], [0], [0], [1], [0, 0, 1, 1], [], []>} : vector<256x128xbf16>, vector<128x128xbf16>, vector<256x128xf32> -> vector<256x128xf32>
    %c0_11 = arith.constant 0 : index
    %c0_12 = arith.constant 0 : index
    %14 = vector.load %arg6[%c0_11, %c0_12] : memref<1x128xf32, #tpu.memory_space<vmem>>, vector<1x128xf32>
    %15 = vector.broadcast %14 : vector<1x128xf32> to vector<256x128xf32>
    %16 = arith.addf %13, %15 : vector<256x128xf32>
    %c0_13 = arith.constant 0 : index
    %c0_14 = arith.constant 0 : index
    %17 = vector.load %arg15[%c0_13, %c0_14] : memref<256x128xf32, #tpu.memory_space<vmem>>, vector<256x128xf32>
    tpu.vector_store %arg15[%c0_13, %c0_14], %16 {strides = array<i32>} : memref<256x128xf32, #tpu.memory_space<vmem>>, vector<256x128xf32>,
    %c0_15 = arith.constant 0 : index
    %c0_16 = arith.constant 0 : index
    %18 = vector.load %arg7[%c0_15, %c0_16] : memref<256x256xbf16, #tpu.memory_space<vmem>>, vector<256x256xbf16>
    %cst_17 = arith.constant dense<0.000000e+00> : vector<256x256xf32>
    %19 = tpu.matmul %0, %18, %cst_17 {dimension_numbers = #tpu.dot_dimension_numbers<[1], [0], [0], [1], [0, 0, 1, 1], [], []>} : vector<256x256xbf16>, vector<256x256xbf16>, vector<256x256xf32> -> vector<256x256xf32>
    %c0_18 = arith.constant 0 : index
    %c0_19 = arith.constant 0 : index
    %20 = vector.load %arg8[%c0_18, %c0_19] : memref<1x256xf32, #tpu.memory_space<vmem>>, vector<1x256xf32>
    %21 = vector.broadcast %20 : vector<1x256xf32> to vector<256x256xf32>
    %22 = arith.mulf %19, %21 : vector<256x256xf32>
    %c0_20 = arith.constant 0 : index
    %c0_21 = arith.constant 0 : index
    %23 = vector.load %arg9[%c0_20, %c0_21] : memref<1x256xf32, #tpu.memory_space<vmem>>, vector<1x256xf32>
    %24 = vector.broadcast %23 : vector<1x256xf32> to vector<256x256xf32>
    %25 = arith.addf %22, %24 : vector<256x256xf32>
    %cst_22 = arith.constant 0.000000e+00 : f32
    %26 = vector.broadcast %cst_22 : f32 to vector<256x256xf32>
    %27 = arith.maximumf %25, %26 : vector<256x256xf32>
    %28 = arith.truncf %27 : vector<256x256xf32> to vector<256x256xbf16>
    %c0_23 = arith.constant 0 : index
    %c0_24 = arith.constant 0 : index
    %29 = vector.load %arg10[%c0_23, %c0_24] : memref<256x128xbf16, #tpu.memory_space<vmem>>, vector<256x128xbf16>
    %cst_25 = arith.constant dense<0.000000e+00> : vector<256x128xf32>
    %30 = tpu.matmul %28, %29, %cst_25 {dimension_numbers = #tpu.dot_dimension_numbers<[1], [0], [0], [1], [0, 0, 1, 1], [], []>} : vector<256x256xbf16>, vector<256x128xbf16>, vector<256x128xf32> -> vector<256x128xf32>
    %c0_26 = arith.constant 0 : index
    %c0_27 = arith.constant 0 : index
    %31 = vector.load %arg11[%c0_26, %c0_27] : memref<1x128xf32, #tpu.memory_space<vmem>>, vector<1x128xf32>
    %32 = vector.broadcast %31 : vector<1x128xf32> to vector<256x128xf32>
    %33 = arith.mulf %30, %32 : vector<256x128xf32>
    %c0_28 = arith.constant 0 : index
    %c0_29 = arith.constant 0 : index
    %34 = vector.load %arg12[%c0_28, %c0_29] : memref<1x128xf32, #tpu.memory_space<vmem>>, vector<1x128xf32>
    %35 = vector.broadcast %34 : vector<1x128xf32> to vector<256x128xf32>
    %36 = arith.addf %33, %35 : vector<256x128xf32>
    %cst_30 = arith.constant 0.000000e+00 : f32
    %37 = vector.broadcast %cst_30 : f32 to vector<256x128xf32>
    %38 = arith.maximumf %36, %37 : vector<256x128xf32>
    %39 = arith.truncf %38 : vector<256x128xf32> to vector<256x128xbf16>
    %c0_31 = arith.constant 0 : index
    %c0_32 = arith.constant 0 : index
    %40 = vector.load %arg13[%c0_31, %c0_32] : memref<128x128xbf16, #tpu.memory_space<vmem>>, vector<128x128xbf16>
    %cst_33 = arith.constant dense<0.000000e+00> : vector<256x128xf32>
    %41 = tpu.matmul %39, %40, %cst_33 {dimension_numbers = #tpu.dot_dimension_numbers<[1], [0], [0], [1], [0, 0, 1, 1], [], []>} : vector<256x128xbf16>, vector<128x128xbf16>, vector<256x128xf32> -> vector<256x128xf32>
    %c0_34 = arith.constant 0 : index
    %c0_35 = arith.constant 0 : index
    %42 = vector.load %arg14[%c0_34, %c0_35] : memref<1x128xf32, #tpu.memory_space<vmem>>, vector<1x128xf32>
    %43 = vector.broadcast %42 : vector<1x128xf32> to vector<256x128xf32>
    %44 = arith.addf %41, %43 : vector<256x128xf32>
    %cst_36 = arith.constant 0.000000e+00 : f32
    %45 = vector.broadcast %cst_36 : f32 to vector<256x128xf32>
    %46 = arith.subf %45, %44 : vector<256x128xf32>
    %47 = math.exp %46 : vector<256x128xf32>
    %cst_37 = arith.constant 1.000000e+00 : f32
    %48 = vector.broadcast %cst_37 : f32 to vector<256x128xf32>
    %49 = arith.addf %48, %47 : vector<256x128xf32>
    %cst_38 = arith.constant 1.000000e+00 : f32
    %50 = vector.broadcast %cst_38 : f32 to vector<256x128xf32>
    %51 = arith.divf %50, %49 : vector<256x128xf32>
    %c0_39 = arith.constant 0 : index
    %c0_40 = arith.constant 0 : index
    %52 = vector.load %arg16[%c0_39, %c0_40] : memref<256x128xf32, #tpu.memory_space<vmem>>, vector<256x128xf32>
    tpu.vector_store %arg16[%c0_39, %c0_40], %51 {strides = array<i32>} : memref<256x128xf32, #tpu.memory_space<vmem>>, vector<256x128xf32>,
    return
  }
  func.func @transform_0(%arg0: i32) -> (i32, i32) {
    %c0_i32 = arith.constant 0 : i32
    %c0_i32_0 = arith.constant 0 : i32
    return %arg0, %c0_i32 : i32, i32
  }
  func.func @transform_1(%arg0: i32) -> (i32, i32) {
    %c0_i32 = arith.constant 0 : i32
    %c0_i32_0 = arith.constant 0 : i32
    %c0_i32_1 = arith.constant 0 : i32
    return %c0_i32, %c0_i32_0 : i32, i32
  }
  func.func @transform_2(%arg0: i32) -> (i32, i32) {
    %c0_i32 = arith.constant 0 : i32
    %c0_i32_0 = arith.constant 0 : i32
    %c0_i32_1 = arith.constant 0 : i32
    return %c0_i32, %c0_i32_0 : i32, i32
  }
  func.func @transform_3(%arg0: i32) -> (i32, i32) {
    %c0_i32 = arith.constant 0 : i32
    %c0_i32_0 = arith.constant 0 : i32
    %c0_i32_1 = arith.constant 0 : i32
    return %c0_i32, %c0_i32_0 : i32, i32
  }
  func.func @transform_4(%arg0: i32) -> (i32, i32) {
    %c0_i32 = arith.constant 0 : i32
    %c0_i32_0 = arith.constant 0 : i32
    %c0_i32_1 = arith.constant 0 : i32
    return %c0_i32, %c0_i32_0 : i32, i32
  }
  func.func @transform_5(%arg0: i32) -> (i32, i32) {
    %c0_i32 = arith.constant 0 : i32
    %c0_i32_0 = arith.constant 0 : i32
    %c0_i32_1 = arith.constant 0 : i32
    return %c0_i32, %c0_i32_0 : i32, i32
  }
  func.func @transform_6(%arg0: i32) -> (i32, i32) {
    %c0_i32 = arith.constant 0 : i32
    %c0_i32_0 = arith.constant 0 : i32
    %c0_i32_1 = arith.constant 0 : i32
    return %c0_i32, %c0_i32_0 : i32, i32
  }
  func.func @transform_7(%arg0: i32) -> (i32, i32) {
    %c0_i32 = arith.constant 0 : i32
    %c0_i32_0 = arith.constant 0 : i32
    %c0_i32_1 = arith.constant 0 : i32
    return %c0_i32, %c0_i32_0 : i32, i32
  }
  func.func @transform_8(%arg0: i32) -> (i32, i32) {
    %c0_i32 = arith.constant 0 : i32
    %c0_i32_0 = arith.constant 0 : i32
    %c0_i32_1 = arith.constant 0 : i32
    return %c0_i32, %c0_i32_0 : i32, i32
  }
  func.func @transform_9(%arg0: i32) -> (i32, i32) {
    %c0_i32 = arith.constant 0 : i32
    %c0_i32_0 = arith.constant 0 : i32
    %c0_i32_1 = arith.constant 0 : i32
    return %c0_i32, %c0_i32_0 : i32, i32
  }
  func.func @transform_10(%arg0: i32) -> (i32, i32) {
    %c0_i32 = arith.constant 0 : i32
    %c0_i32_0 = arith.constant 0 : i32
    %c0_i32_1 = arith.constant 0 : i32
    return %c0_i32, %c0_i32_0 : i32, i32
  }
  func.func @transform_11(%arg0: i32) -> (i32, i32) {
    %c0_i32 = arith.constant 0 : i32
    %c0_i32_0 = arith.constant 0 : i32
    %c0_i32_1 = arith.constant 0 : i32
    return %c0_i32, %c0_i32_0 : i32, i32
  }
  func.func @transform_12(%arg0: i32) -> (i32, i32) {
    %c0_i32 = arith.constant 0 : i32
    %c0_i32_0 = arith.constant 0 : i32
    %c0_i32_1 = arith.constant 0 : i32
    return %c0_i32, %c0_i32_0 : i32, i32
  }
  func.func @transform_13(%arg0: i32) -> (i32, i32) {
    %c0_i32 = arith.constant 0 : i32
    %c0_i32_0 = arith.constant 0 : i32
    %c0_i32_1 = arith.constant 0 : i32
    return %c0_i32, %c0_i32_0 : i32, i32
  }
  func.func @transform_14(%arg0: i32) -> (i32, i32) {
    %c0_i32 = arith.constant 0 : i32
    %c0_i32_0 = arith.constant 0 : i32
    return %arg0, %c0_i32 : i32, i32
  }
  func.func @transform_15(%arg0: i32) -> (i32, i32) {
    %c0_i32 = arith.constant 0 : i32
    %c0_i32_0 = arith.constant 0 : i32
    return %arg0, %c0_i32 : i32, i32
  }
}

</mosaic_0001>

<bundles_post_ra>
// kernel: tpu_custom_call.1
= control target key start
LH: loop header
LB: loop body
LE: loop exit
PB: predicated region body
PF: predicated region fallthrough
CT: control target
= control target key end

     0   :  { %21 = vsyncpa [#allocation3], 0  ;;  %s4149_s0 = inlined_call_operand.hbm [shape: bf16[256,256], index: 0, kind: input, shape index: {}]   ;;  %s4150_s1 = inlined_call_operand.hbm [shape: bf16[256,128], index: 1, kind: input, shape index: {}]   ;;  %s4151_s2 = inlined_call_operand.vmem [shape: f32[1,128], index: 2, kind: input, shape index: {}]   ;;  %s4152_s3 = inlined_call_operand.hbm [shape: f32[1,128], index: 3, kind: input, shape index: {}]   ;;  %s4153_s4 = inlined_call_operand.hbm [shape: bf16[128,128], index: 4, kind: input, shape index: {}]   ;;  %s4154_s5 = inlined_call_operand.vmem [shape: f32[1,128], index: 5, kind: input, shape index: {}]   ;;  %s4155_s6 = inlined_call_operand.hbm [shape: bf16[256,256], index: 6, kind: input, shape index: {}]   ;;  %s4156_s7 = inlined_call_operand.vmem [shape: f32[1,256], index: 7, kind: input, shape index: {}]   ;;  %s4157_s8 = inlined_call_operand.vmem [shape: f32[1,256], index: 8, kind: input, shape index: {}]   ;;  %s4158_s9 = inlined_call_operand.hbm [shape: bf16[256,128], index: 9, kind: input, shape index: {}]   ;;  %s4159_s10 = inlined_call_operand.vmem [shape: f32[1,128], index: 10, kind: input, shape index: {}]   ;;  %s4160_s11 = inlined_call_operand.vmem [shape: f32[1,128], index: 11, kind: input, shape index: {}]   ;;  %s4161_s12 = inlined_call_operand.hbm [shape: bf16[128,128], index: 12, kind: input, shape index: {}]   ;;  %s4162_s13 = inlined_call_operand.vmem [shape: f32[1,128], index: 13, kind: input, shape index: {}]   ;;  %s4163_s14 = inlined_call_operand.hbm [shape: f32[256,128], index: 14, kind: output, shape index: {0}]   ;;  %s4164_s15 = inlined_call_operand.hbm [shape: f32[256,128], index: 15, kind: output, shape index: {1}]  }
   0x1   :  { %22 = vsyncpa [#allocation6], 0 }
   0x2   :  { %23 = vsyncpa [#allocation9], 0 }
   0x3   :  { %24 = vsyncpa [#allocation12], 0 }
   0x4   :  { %25 = vsyncpa [#allocation4], 0 }
   0x5   :  { %26 = vsyncpa [#allocation16], 0  ;;  %s3520_s18 = smov [#allocation5]  }
   0x6   :  { %s44_s19 = sshll.u32 %s3520_s18, 4  ;;  %s45_s19 = int_to_ptr.vmem [resolvable:$true] %s44_s19 }
   0x7   :  { %s3336_s20 = scalar_lea.vmem %s45_s19, 2048  ;;  %p3341_p1 = scmp.lt.s32.totalorder %s45_s19, %s45_s19 }
   0x8   :  { %p3337_p0 = scmp.ne.s32.totalorder %s45_s19, %s3336_s20  ;;  %p3342_p2 = scmp.lt.s32.totalorder %s3336_s20, %s3336_s20 }
   0xa   :  { %p3343_p3 = por %p3342_p2, %p3341_p1 }
   0xc   :  { %p3344_p4 = pnand %p3343_p3, %p3337_p0 }
   0xe   :  { %3347 = shalt.err (!%p3344_p4)
}
   0xf   :  { %s3521_s21 = smov 64   ;;  %s3522_s22 = smov 4  }
  0x10   :  { %50 = dma.hbm_to_vmem [thread:$0]  %s4150_s1, 2048, %s45_s19, [#allocation6], %s3521_s21, %s3521_s21, %s3522_s22  }
  0x11   :  { %s3523_s25 = smov [#allocation8]   ;;  %s3524_s27 = smov [#allocation11]  }
  0x12   :  { %s68_s26 = sshll.u32 %s3523_s25, 4  ;;  %s98_s28 = sshll.u32 %s3524_s27, 4  ;;  %s69_s26 = int_to_ptr.vmem [resolvable:$true] %s68_s26  ;;  %s99_s28 = int_to_ptr.vmem [resolvable:$true] %s98_s28 }
  0x13   :  { %s3356_s29 = scalar_lea.vmem %s69_s26, 1024  ;;  %p3361_p6 = scmp.lt.s32.totalorder %s69_s26, %s69_s26 }
  0x14   :  { %p3357_p5 = scmp.ne.s32.totalorder %s69_s26, %s3356_s29  ;;  %p3362_p7 = scmp.lt.s32.totalorder %s3356_s29, %s3356_s29 }
  0x16   :  { %p3363_p8 = por %p3362_p7, %p3361_p6 }
  0x18   :  { %p3364_p9 = pnand %p3363_p8, %p3357_p5 }
  0x1a   :  { %3367 = shalt.err (!%p3364_p9)
}
  0x1b   :  { %74 = dma.hbm_to_vmem [thread:$0]  %s4153_s4, 1024, %s69_s26, [#allocation9], %s3521_s21, %s3521_s21, %s3522_s22  }
  0x1c   :  { %s3376_s1 = scalar_lea.vmem %s99_s28, 2048  ;;  %p3381_p11 = scmp.lt.s32.totalorder %s99_s28, %s99_s28 }
  0x1d   :  { %p3377_p10 = scmp.ne.s32.totalorder %s99_s28, %s3376_s1  ;;  %p3382_p12 = scmp.lt.s32.totalorder %s3376_s1, %s3376_s1 }
  0x1f   :  { %p3383_p13 = por %p3382_p12, %p3381_p11 }
  0x21   :  { %p3384_p0 = pnand %p3383_p13, %p3377_p10 }
  0x23   :  { %3387 = shalt.err (!%p3384_p0)
}
  0x24   :  { %104 = dma.hbm_to_vmem [thread:$0]  %s4158_s9, 2048, %s99_s28, [#allocation12], %s3521_s21, %s3521_s21, %s3522_s22  }
  0x25   :  { %s3525_s19 = smov [#allocation2]  }
  0x26   :  { %s32_s20 = sshll.u32 %s3525_s19, 4  ;;  %s33_s20 = int_to_ptr.vmem [resolvable:$true] %s32_s20 }
  0x27   :  { %s3396_s23 = scalar_lea.vmem %s33_s20, 4096  ;;  %p3401_p2 = scmp.lt.s32.totalorder %s33_s20, %s33_s20 }
  0x28   :  { %p3397_p1 = scmp.ne.s32.totalorder %s33_s20, %s3396_s23  ;;  %p3402_p3 = scmp.lt.s32.totalorder %s3396_s23, %s3396_s23 }
  0x2a   :  { %p3403_p4 = por %p3402_p3, %p3401_p2 }
  0x2c   :  { %p3404_p5 = pnand %p3403_p4, %p3397_p1 }
  0x2e   :  { %3407 = shalt.err (!%p3404_p5)
}
  0x2f   :  { %s3526_s4 = smov 128   ;;  %s3527_s24 = smov 8  }
  0x30   :  { %38 = dma.hbm_to_vmem [thread:$0]  %s4149_s0, 4096, %s33_s20, [#allocation3], %s3526_s4, %s3526_s4, %s3527_s24  }
  0x31   :  { %s3528_s9 = smov [#allocation7]   ;;  %s3529_s28 = smov [#allocation10]  }
  0x32   :  { %s59_s27 = sshll.u32 %s3528_s9, 4  ;;  %s82_s29 = sshll.u32 %s3529_s28, 4  ;;  %s60_s27 = int_to_ptr.vmem [resolvable:$true] %s59_s27  ;;  %s83_s29 = int_to_ptr.vmem [resolvable:$true] %s82_s29 }
  0x33   :  { %s3416_s30 = scalar_lea.vmem %s60_s27, 16  ;;  %s3420_s16 = scalar_lea.vmem %s60_s27, 32 }
  0x34   :  { %p3417_p6 = scmp.ne.s32.totalorder %s60_s27, %s3416_s30  ;;  %p3421_p7 = scmp.lt.s32.totalorder %s60_s27, %s60_s27 }
  0x35   :  { %p3422_p8 = scmp.lt.s32.totalorder %s3420_s16, %s3416_s30 }
  0x37   :  { %p3423_p9 = por %p3422_p8, %p3421_p7 }
  0x39   :  { %p3424_p10 = pnand %p3423_p9, %p3417_p6 }
  0x3b   :  { %3427 = shalt.err (!%p3424_p10)
}
  0x3c   :  { %62 = dma.hbm_to_vmem [thread:$0]  %s4152_s3, 16, %s60_s27, [#allocation6]  }
  0x3d   :  { %s3436_s18 = scalar_lea.vmem %s83_s29, 4096  ;;  %p3441_p12 = scmp.lt.s32.totalorder %s83_s29, %s83_s29 }
  0x3e   :  { %p3437_p11 = scmp.ne.s32.totalorder %s83_s29, %s3436_s18  ;;  %p3442_p13 = scmp.lt.s32.totalorder %s3436_s18, %s3436_s18 }
  0x40   :  { %p3443_p0 = por %p3442_p13, %p3441_p12 }
  0x42   :  { %p3444_p1 = pnand %p3443_p0, %p3437_p11 }
  0x44   :  { %3447 = shalt.err (!%p3444_p1)
}
  0x45   :  { %88 = dma.hbm_to_vmem [thread:$0]  %s4155_s6, 4096, %s83_s29, [#allocation9], %s3526_s4, %s3526_s4, %s3527_s24  }
  0x46   :  { %s3530_s20 = smov [#allocation13]  }
  0x47   :  { %s114_s23 = sshll.u32 %s3530_s20, 4  ;;  %s115_s23 = int_to_ptr.vmem [resolvable:$true] %s114_s23 }
  0x48   :  { %s3456_s25 = scalar_lea.vmem %s115_s23, 1024  ;;  %p3461_p3 = scmp.lt.s32.totalorder %s115_s23, %s115_s23 }
  0x49   :  { %p3457_p2 = scmp.ne.s32.totalorder %s115_s23, %s3456_s25  ;;  %p3462_p4 = scmp.lt.s32.totalorder %s3456_s25, %s3456_s25 }
  0x4b   :  { %p3463_p5 = por %p3462_p4, %p3461_p3 }
  0x4d   :  { %p3464_p6 = pnand %p3463_p5, %p3457_p2 }
  0x4f   :  { %3467 = shalt.err (!%p3464_p6)
}
  0x50   :  { %120 = dma.hbm_to_vmem [thread:$0]  %s4161_s12, 1024, %s115_s23, [#allocation12], %s3521_s21, %s3521_s21, %s3522_s22  }
  0x51   :  { %3508 = dma.done.wait [#allocation3], 4096  }
  0x52   :  { %3509 = vsyncadd [#allocation3], 4294963200 }
  0x53   :  { %3510 = dma.done.wait [#allocation6], 2064  }
  0x54   :  { %3511 = vsyncadd [#allocation6], 4294965232 }
  0x55   :  { %3512 = dma.done.wait [#allocation9], 5120  }
  0x56   :  { %3513 = vsyncadd [#allocation9], 4294962176 }
  0x57   :  { %3514 = dma.done.wait [#allocation12], 3072  }
  0x58   :  { %3515 = vsyncadd [#allocation12], 4294964224  ;;  %v3055_v0 = vld [vmem:[#allocation5 + $0x78] sm:$0xff]   ;;  %v3057_v2 = vld [vmem:[#allocation5 + $0x70] sm:$0xff]  }
  0x59   :  { %v3056_v1 = vld [vmem:[#allocation5 + $0x38] sm:$0xff]   ;;  %2674 = vmatprep.subr.bf16.mxu0 %v3055_v0  ;;  %v3058_v3 = vld [vmem:[#allocation5 + $0x30] sm:$0xff]   ;;  %v3059_v4 = vld [vmem:[#allocation5 + $0x68] sm:$0xff]  }
  0x5a   :  { %2675 = vmatpush3.bf16.msra.mxu0 %v3056_v1  ;;  %v3060_v5 = vld [vmem:[#allocation5 + $0x28] sm:$0xff]   ;;  %v3061_v6 = vld [vmem:[#allocation5 + $0x60] sm:$0xff]   ;;  %v3063_v8 = vld [vmem:[#allocation5 + $0x58] sm:$0xff]  }
  0x5b   :  { %2676 = vmatprep.subr.bf16.mxu0 %v3057_v2  ;;  %v3062_v7 = vld [vmem:[#allocation5 + $0x20] sm:$0xff]   ;;  %v3064_v9 = vld [vmem:[#allocation5 + $0x18] sm:$0xff]   ;;  %v3065_v10 = vld [vmem:[#allocation5 + $0x50] sm:$0xff]  }
  0x5c   :  { %v3073_v11 = vld [vmem:[#allocation2 + $0x4] ss:$8 sps:$4 sm:$0xff]   ;;  %v3066_v12 = vld [vmem:[#allocation5 + $0x10] sm:$0xff]   ;;  %v3652_v17 = vld [vmem:[#allocation2] ss:$8 sps:$4 sm:$0xff]  }
  0x5d   :  { %497 = vmatprep.mubr.bf16.mxu0 %v3073_v11  ;;  %v3067_v13 = vld [vmem:[#allocation5 + $0x48] sm:$0xff]   ;;  %v3069_v15 = vld [vmem:[#allocation5 + $0x40] sm:$0xff]   ;;  %v3654_v18 = vld [vmem:[#allocation2 + $0x14] ss:$8 sps:$4 sm:$0xff]  }
  0x5e   :  { %2677 = vmatpush3.bf16.msra.mxu0 %v3058_v3  ;;  %v3068_v14 = vld [vmem:[#allocation5 + $0x8] sm:$0xff]   ;;  %v3070_v16 = vld [vmem:[#allocation5] sm:$0xff]   ;;  %v3658_v19 = vld [vmem:[#allocation2 + $0x10] ss:$8 sps:$4 sm:$0xff]  }
  0x5f   :  { %2678 = vmatprep.subr.bf16.mxu0 %v3059_v4  ;;  %v3660_v20 = vld [vmem:[#allocation2 + $0x24] ss:$8 sps:$4 sm:$0xff]   ;;  %v3119_v21 = vld [vmem:[#allocation8 + $0x38] sm:$0xff]   ;;  %v3120_v22 = vld [vmem:[#allocation8 + $0x30] sm:$0xff]  }
  0x60   :  { %2946 = vmatprep.subr.bf16.mxu1 %v3119_v21  ;;  %v3664_v23 = vld [vmem:[#allocation2 + $0x20] ss:$8 sps:$4 sm:$0xff]   ;;  %v3666_v24 = vld [vmem:[#allocation2 + $0x34] ss:$8 sps:$4 sm:$0xff]   ;;  %v3670_v25 = vld [vmem:[#allocation2 + $0x30] ss:$8 sps:$4 sm:$0xff]  }
  0x61   :  { %2947 = vmatpush3.bf16.msra.mxu1 %v3119_v21  ;;  %v3672_v26 = vld [vmem:[#allocation2 + $0x44] ss:$8 sps:$4 sm:$0xff]   ;;  %v3676_v27 = vld [vmem:[#allocation2 + $0x40] ss:$8 sps:$4 sm:$0xff]   ;;  %v3678_v28 = vld [vmem:[#allocation2 + $0x54] ss:$8 sps:$4 sm:$0xff]  }
  0x62   :  { %2679 = vmatpush3.bf16.msra.mxu0 %v3060_v5  ;;  %2948 = vmatprep.subr.bf16.mxu1 %v3120_v22  ;;  %v3682_v29 = vld [vmem:[#allocation2 + $0x50] ss:$8 sps:$4 sm:$0xff]   ;;  %v3684_v30 = vld [vmem:[#allocation2 + $0x64] ss:$8 sps:$4 sm:$0xff]   ;;  %v3688_v31 = vld [vmem:[#allocation2 + $0x60] ss:$8 sps:$4 sm:$0xff]  }
  0x63   :  { %2680 = vmatprep.subr.bf16.mxu0 %v3061_v6  ;;  %v3690_v32 = vld [vmem:[#allocation2 + $0x74] ss:$8 sps:$4 sm:$0xff]   ;;  %v3694_v33 = vld [vmem:[#allocation2 + $0x70] ss:$8 sps:$4 sm:$0xff]   ;;  %v3696_v34 = vld [vmem:[#allocation2 + $0x84] ss:$8 sps:$4 sm:$0xff]  }
  0x64   :  { %v3700_v35 = vld [vmem:[#allocation2 + $0x80] ss:$8 sps:$4 sm:$0xff]   ;;  %v3702_v36 = vld [vmem:[#allocation2 + $0x94] ss:$8 sps:$4 sm:$0xff]   ;;  %v3706_v39 = vld [vmem:[#allocation2 + $0x90] ss:$8 sps:$4 sm:$0xff]  }
  0x65   :  { %2949 = vmatpush3.bf16.msra.mxu1 %v3120_v22  ;;  %v3121_v37 = vld [vmem:[#allocation8 + $0x28] sm:$0xff]   ;;  %v3122_v38 = vld [vmem:[#allocation8 + $0x20] sm:$0xff]   ;;  %v3123_v41 = vld [vmem:[#allocation8 + $0x18] sm:$0xff]  }
  0x66   :  { %2681 = vmatpush3.bf16.msra.mxu0 %v3062_v7  ;;  %2950 = vmatprep.subr.bf16.mxu1 %v3121_v37  ;;  %v3708_v40 = vld [vmem:[#allocation2 + $0xa4] ss:$8 sps:$4 sm:$0xff]   ;;  %v3124_v42 = vld [vmem:[#allocation8 + $0x10] sm:$0xff]   ;;  %v3712_v43 = vld [vmem:[#allocation2 + $0xa0] ss:$8 sps:$4 sm:$0xff]  }
  0x67   :  { %2682 = vmatprep.subr.bf16.mxu0 %v3063_v8  ;;  %v3714_v44 = vld [vmem:[#allocation2 + $0xb4] ss:$8 sps:$4 sm:$0xff]   ;;  %v3125_v45 = vld [vmem:[#allocation8 + $0x8] sm:$0xff]   ;;  %v3126_v46 = vld [vmem:[#allocation8] sm:$0xff]  }
  0x68   :  { %v3718_v47 = vld [vmem:[#allocation2 + $0xb0] ss:$8 sps:$4 sm:$0xff]   ;;  %v3720_v48 = vld [vmem:[#allocation2 + $0xc4] ss:$8 sps:$4 sm:$0xff]   ;;  %v3724_v49 = vld [vmem:[#allocation2 + $0xc0] ss:$8 sps:$4 sm:$0xff]  }
  0x69   :  { %2951 = vmatpush3.bf16.msra.mxu1 %v3121_v37  ;;  %v3726_v50 = vld [vmem:[#allocation2 + $0xd4] ss:$8 sps:$4 sm:$0xff]   ;;  %v3730_v51 = vld [vmem:[#allocation2 + $0xd0] ss:$8 sps:$4 sm:$0xff]   ;;  %v3732_v52 = vld [vmem:[#allocation2 + $0xe4] ss:$8 sps:$4 sm:$0xff]  }
  0x6a   :  { %2683 = vmatpush3.bf16.msra.mxu0 %v3064_v9  ;;  %2952 = vmatprep.subr.bf16.mxu1 %v3122_v38  ;;  %v3736_v53 = vld [vmem:[#allocation2 + $0xe0] ss:$8 sps:$4 sm:$0xff]   ;;  %v3738_v54 = vld [vmem:[#allocation2 + $0xf4] ss:$8 sps:$4 sm:$0xff]   ;;  %v3742_v55 = vld [vmem:[#allocation2 + $0xf0] ss:$8 sps:$4 sm:$0xff]  }
  0x6b   :  { %2684 = vmatprep.subr.bf16.mxu0 %v3065_v10  ;;  %v3129_v56 = vld [vmem:[#allocation10 + $0x74] ss:$8 sps:$4 sm:$0xff]  }
  0x6c   :  { %v3748_v59 = vld [vmem:[%s4151_s2] ss:$0 sm:$0xff] }
  0x6d   :  { %2953 = vmatpush3.bf16.msra.mxu1 %v3122_v38  ;;  %v3751_v0 = vld [vmem:[#allocation7] ss:$0 sm:$0xff] }
  0x6e   :  { %2685 = vmatpush3.bf16.msra.mxu0 %v3066_v12  ;;  %2954 = vmatprep.subr.bf16.mxu1 %v3123_v41 }
  0x6f   :  { %2686 = vmatprep.subr.bf16.mxu0 %v3067_v13 }
  0x71   :  { %2955 = vmatpush3.bf16.msra.mxu1 %v3123_v41 }
  0x72   :  { %2687 = vmatpush3.bf16.msra.mxu0 %v3068_v14  ;;  %2956 = vmatprep.subr.bf16.mxu1 %v3124_v42 }
  0x73   :  { %2688 = vmatprep.subr.bf16.mxu0 %v3069_v15 }
  0x75   :  { %2957 = vmatpush3.bf16.msra.mxu1 %v3124_v42 }
  0x76   :  { %2689 = vmatpush3.bf16.msra.mxu0 %v3070_v16  ;;  %2958 = vmatprep.subr.bf16.mxu1 %v3125_v45 }
  0x79   :  { %498 = vmatmul.mubr.bf16.vlgmr.msra.gmra.mxu0 %v3652_v17  ;;  %2959 = vmatpush3.bf16.msra.mxu1 %v3125_v45 }
  0x7a   :  { %505 = vmatprep.mubr.bf16.mxu0 %v3654_v18  ;;  %2960 = vmatprep.subr.bf16.mxu1 %v3126_v46 }
  0x7d   :  { %2961 = vmatpush3.bf16.msra.mxu1 %v3126_v46 }
  0x7e   :  { %1208 = vmatprep.subr.bf16.mxu1 %v3129_v56 }
  0x81   :  { %506 = vmatmul.mubr.bf16.gmra.mxu0 %v3658_v19 }
  0x82   :  { %513 = vmatprep.mubr.bf16.mxu0 %v3660_v20 }
  0x89   :  { %514 = vmatmul.mubr.bf16.gmra.mxu0 %v3664_v23 }
  0x8a   :  { %521 = vmatprep.mubr.bf16.mxu0 %v3666_v24 }
  0x91   :  { %522 = vmatmul.mubr.bf16.gmra.mxu0 %v3670_v25 }
  0x92   :  { %529 = vmatprep.mubr.bf16.mxu0 %v3672_v26 }
  0x99   :  { %530 = vmatmul.mubr.bf16.gmra.mxu0 %v3676_v27 }
  0x9a   :  { %537 = vmatprep.mubr.bf16.mxu0 %v3678_v28 }
  0xa1   :  { %538 = vmatmul.mubr.bf16.gmra.mxu0 %v3682_v29 }
  0xa2   :  { %545 = vmatprep.mubr.bf16.mxu0 %v3684_v30 }
  0xa9   :  { %546 = vmatmul.mubr.bf16.gmra.mxu0 %v3688_v31 }
  0xaa   :  { %553 = vmatprep.mubr.bf16.mxu0 %v3690_v32 }
  0xb1   :  { %554 = vmatmul.mubr.bf16.gmra.mxu0 %v3694_v33 }
  0xb2   :  { %561 = vmatprep.mubr.bf16.mxu0 %v3696_v34 }
  0xb9   :  { %562 = vmatmul.mubr.bf16.gmra.mxu0 %v3700_v35 }
  0xba   :  { %569 = vmatprep.mubr.bf16.mxu0 %v3702_v36 }
  0xc1   :  { %570 = vmatmul.mubr.bf16.gmra.mxu0 %v3706_v39 }
  0xc2   :  { %577 = vmatprep.mubr.bf16.mxu0 %v3708_v40 }
  0xc9   :  { %578 = vmatmul.mubr.bf16.gmra.mxu0 %v3712_v43 }
  0xca   :  { %585 = vmatprep.mubr.bf16.mxu0 %v3714_v44 }
  0xd1   :  { %586 = vmatmul.mubr.bf16.gmra.mxu0 %v3718_v47 }
  0xd2   :  { %593 = vmatprep.mubr.bf16.mxu0 %v3720_v48 }
  0xd9   :  { %594 = vmatmul.mubr.bf16.gmra.mxu0 %v3724_v49 }
  0xda   :  { %601 = vmatprep.mubr.bf16.mxu0 %v3726_v50 }
  0xe1   :  { %602 = vmatmul.mubr.bf16.gmra.mxu0 %v3730_v51 }
  0xe2   :  { %609 = vmatprep.mubr.bf16.mxu0 %v3732_v52 }
  0xe9   :  { %610 = vmatmul.mubr.bf16.gmra.mxu0 %v3736_v53 }
  0xea   :  { %617 = vmatprep.mubr.bf16.mxu0 %v3738_v54 }
  0xf1   :  { %618 = vmatmul.mubr.bf16.gmra.mxu0 %v3742_v55 }
 0x139   :  { %v2690_v57 = vpop.f32.mrf.mxu0 }
 0x13b   :  { %v2691_v58 = vpop.f32.mrf.mxu0 }
 0x13c   :  { %v2692_v60 = vadd.f32 %v2691_v58, %v2690_v57  ;;  %v3127_v57 = vld [vmem:[#allocation10 + $0x70] ss:$8 sps:$4 sm:$0xff]  }
 0x13d   :  { %v2693_v61 = vpop.f32.mrf.mxu0 }
 0x13e   :  { %v633_v62 = vmul.f32 %v2692_v60, %v3748_v59 }
 0x13f   :  { %v2694_v63 = vpop.f32.mrf.mxu0 }
 0x140   :  { %v2695_v1 = vadd.f32 %v2694_v63, %v2693_v61  ;;  %v672_v4 = vadd.f32 %v3751_v0, %v633_v62  ;;  %v3132_v61 = vld [vmem:[#allocation10 + $0x64] ss:$8 sps:$4 sm:$0xff]  }
 0x141   :  { %v2696_v2 = vpop.f32.mrf.mxu0 }
 0x142   :  { %v634_v3 = vmul.f32 %v2695_v1, %v3748_v59  ;;  %v704_v10 = vmax.f32 %v672_v4, 0.0 }
 0x143   :  { %v2697_v5 = vpop.f32.mrf.mxu0 }
 0x144   :  { %v2698_v6 = vadd.f32 %v2697_v5, %v2696_v2  ;;  %v673_v7 = vadd.f32 %v3751_v0, %v634_v3  ;;  %v3130_v3 = vld [vmem:[#allocation10 + $0x60] ss:$8 sps:$4 sm:$0xff]  }
 0x145   :  { %v2699_v8 = vpop.f32.mrf.mxu0 }
 0x146   :  { %v635_v9 = vmul.f32 %v2698_v6, %v3748_v59  ;;  %v705_v11 = vmax.f32 %v673_v7, 0.0  ;;  %v3135_v6 = vld [vmem:[#allocation10 + $0x54] ss:$8 sps:$4 sm:$0xff]  }
 0x147   :  { %v2700_v12 = vpop.f32.mrf.mxu0 }
 0x148   :  { %v2701_v13 = vadd.f32 %v2700_v12, %v2699_v8  ;;  %v736_v14 = vpack.c.bf16 %v705_v11, %v704_v10  ;;  %v674_v16 = vadd.f32 %v3751_v0, %v635_v9  ;;  %v3133_v12 = vld [vmem:[#allocation10 + $0x50] ss:$8 sps:$4 sm:$0xff]  }
 0x149   :  { %v2702_v15 = vpop.f32.mrf.mxu0 }
 0x14a   :  { %v636_v21 = vmul.f32 %v2701_v13, %v3748_v59  ;;  %2962 = vmatprep.mubr.bf16.mxu1 %v736_v14  ;;  %v706_v42 = vmax.f32 %v674_v16, 0.0 }
 0x14b   :  { %v2703_v22 = vpop.f32.mrf.mxu0 }
 0x14c   :  { %v675_v37 = vadd.f32 %v3751_v0, %v636_v21  ;;  %v2704_v38 = vadd.f32 %v2703_v22, %v2702_v15  ;;  %v3138_v15 = vld [vmem:[#allocation10 + $0x44] ss:$8 sps:$4 sm:$0xff]  }
 0x14d   :  { %v2705_v41 = vpop.f32.mrf.mxu0 }
 0x14e   :  { %v637_v45 = vmul.f32 %v2704_v38, %v3748_v59  ;;  %v707_v46 = vmax.f32 %v675_v37, 0.0  ;;  %v3136_v38 = vld [vmem:[#allocation10 + $0x40] ss:$8 sps:$4 sm:$0xff]  }
 0x14f   :  { %v2706_v56 = vpop.f32.mrf.mxu0 }
 0x150   :  { %v2707_v58 = vadd.f32 %v2706_v56, %v2705_v41  ;;  %v737_v60 = vpack.c.bf16 %v707_v46, %v706_v42  ;;  %v676_v63 = vadd.f32 %v3751_v0, %v637_v45  ;;  %v3141_v45 = vld [vmem:[#allocation10 + $0x34] ss:$8 sps:$4 sm:$0xff]  }
 0x151   :  { %v2708_v62 = vpop.f32.mrf.mxu0 }
 0x152   :  { %v638_v1 = vmul.f32 %v2707_v58, %v3748_v59  ;;  %2963 = vmatmul.mubr.bf16.vlgmr.msra.gmra.mxu1 %v737_v60  ;;  %v708_v8 = vmax.f32 %v676_v63, 0.0 }
 0x153   :  { %v2709_v2 = vpop.f32.mrf.mxu0  ;;  %1209 = vmatpush1.bf16.msra.mxu1 %v3127_v57 }
 0x154   :  { %v677_v4 = vadd.f32 %v3751_v0, %v638_v1  ;;  %v2710_v5 = vadd.f32 %v2709_v2, %v2708_v62  ;;  %1210 = vmatprep.subr.bf16.mxu1 %v3132_v61  ;;  %v3139_v61 = vld [vmem:[#allocation10 + $0x30] ss:$8 sps:$4 sm:$0xff]   ;;  %v3144_v1 = vld [vmem:[#allocation10 + $0x24] ss:$8 sps:$4 sm:$0xff]  }
 0x155   :  { %v2711_v7 = vpop.f32.mrf.mxu0 }
 0x156   :  { %v639_v9 = vmul.f32 %v2710_v5, %v3748_v59  ;;  %v709_v10 = vmax.f32 %v677_v4, 0.0 }
 0x157   :  { %v2712_v11 = vpop.f32.mrf.mxu0  ;;  %1211 = vmatpush1.bf16.msra.mxu1 %v3130_v3 }
 0x158   :  { %v2713_v13 = vadd.f32 %v2712_v11, %v2711_v7  ;;  %v738_v14 = vpack.c.bf16 %v709_v10, %v708_v8  ;;  %1212 = vmatprep.subr.bf16.mxu1 %v3135_v6  ;;  %v678_v21 = vadd.f32 %v3751_v0, %v639_v9  ;;  %v3142_v6 = vld [vmem:[#allocation10 + $0x20] ss:$8 sps:$4 sm:$0xff]   ;;  %v3147_v9 = vld [vmem:[#allocation10 + $0x14] ss:$8 sps:$4 sm:$0xff]  }
 0x159   :  { %v2714_v16 = vpop.f32.mrf.mxu0 }
 0x15a   :  { %v640_v22 = vmul.f32 %v2713_v13, %v3748_v59  ;;  %2966 = vmatprep.mubr.bf16.mxu1 %v738_v14  ;;  %v710_v56 = vmax.f32 %v678_v21, 0.0 }
 0x15b   :  { %v2715_v37 = vpop.f32.mrf.mxu0  ;;  %1213 = vmatpush1.bf16.msra.mxu1 %v3133_v12 }
 0x15c   :  { %v679_v41 = vadd.f32 %v3751_v0, %v640_v22  ;;  %v2716_v42 = vadd.f32 %v2715_v37, %v2714_v16  ;;  %1214 = vmatprep.subr.bf16.mxu1 %v3138_v15  ;;  %v3145_v15 = vld [vmem:[#allocation10 + $0x10] ss:$8 sps:$4 sm:$0xff]   ;;  %v3150_v22 = vld [vmem:[#allocation10 + $0x4] ss:$8 sps:$4 sm:$0xff]  }
 0x15d   :  { %v2717_v46 = vpop.f32.mrf.mxu0 }
 0x15e   :  { %v641_v57 = vmul.f32 %v2716_v42, %v3748_v59  ;;  %v711_v58 = vmax.f32 %v679_v41, 0.0 }
 0x15f   :  { %v2718_v60 = vpop.f32.mrf.mxu0  ;;  %1215 = vmatpush1.bf16.msra.mxu1 %v3136_v38 }
 0x160   :  { %v2719_v62 = vadd.f32 %v2718_v60, %v2717_v46  ;;  %v739_v63 = vpack.c.bf16 %v711_v58, %v710_v56  ;;  %1216 = vmatprep.subr.bf16.mxu1 %v3141_v45  ;;  %v680_v3 = vadd.f32 %v3751_v0, %v641_v57  ;;  %v3148_v45 = vld [vmem:[#allocation10] ss:$8 sps:$4 sm:$0xff]   ;;  %v3153_v57 = vld [vmem:[#allocation10 + $0xf4] ss:$8 sps:$4 sm:$0xff]  }
 0x161   :  { %v2720_v2 = vpop.f32.mrf.mxu0 }
 0x162   :  { %v642_v4 = vmul.f32 %v2719_v62, %v3748_v59  ;;  %2967 = vmatmul.mubr.bf16.gmra.mxu1 %v739_v63  ;;  %v712_v11 = vmax.f32 %v680_v3, 0.0 }
 0x163   :  { %v2721_v5 = vpop.f32.mrf.mxu0  ;;  %1217 = vmatpush1.bf16.msra.mxu1 %v3139_v61 }
 0x164   :  { %v681_v7 = vadd.f32 %v3751_v0, %v642_v4  ;;  %v2722_v8 = vadd.f32 %v2721_v5, %v2720_v2  ;;  %1218 = vmatprep.subr.bf16.mxu1 %v3144_v1  ;;  %v3151_v1 = vld [vmem:[#allocation10 + $0xf0] ss:$8 sps:$4 sm:$0xff]   ;;  %v3156_v4 = vld [vmem:[#allocation10 + $0xe4] ss:$8 sps:$4 sm:$0xff]  }
 0x165   :  { %v2723_v10 = vpop.f32.mrf.mxu0 }
 0x166   :  { %v713_v12 = vmax.f32 %v681_v7, 0.0  ;;  %v643_v13 = vmul.f32 %v2722_v8, %v3748_v59 }
 0x167   :  { %v2724_v14 = vpop.f32.mrf.mxu0  ;;  %1219 = vmatpush1.bf16.msra.mxu1 %v3142_v6 }
 0x168   :  { %v2725_v16 = vadd.f32 %v2724_v14, %v2723_v10  ;;  %v740_v21 = vpack.c.bf16 %v713_v12, %v712_v11  ;;  %1220 = vmatprep.subr.bf16.mxu1 %v3147_v9  ;;  %v682_v38 = vadd.f32 %v3751_v0, %v643_v13  ;;  %v3154_v9 = vld [vmem:[#allocation10 + $0xe0] ss:$8 sps:$4 sm:$0xff]   ;;  %v3159_v12 = vld [vmem:[#allocation10 + $0xd4] ss:$8 sps:$4 sm:$0xff]  }
 0x169   :  { %v2726_v37 = vpop.f32.mrf.mxu0 }
 0x16a   :  { %v644_v41 = vmul.f32 %v2725_v16, %v3748_v59  ;;  %2970 = vmatprep.mubr.bf16.mxu1 %v740_v21  ;;  %v714_v60 = vmax.f32 %v682_v38, 0.0 }
 0x16b   :  { %v2727_v42 = vpop.f32.mrf.mxu0  ;;  %1221 = vmatpush1.bf16.msra.mxu1 %v3145_v15 }
 0x16c   :  { %v683_v46 = vadd.f32 %v3751_v0, %v644_v41  ;;  %v2728_v56 = vadd.f32 %v2727_v42, %v2726_v37  ;;  %1222 = vmatprep.subr.bf16.mxu1 %v3150_v22  ;;  %v3157_v22 = vld [vmem:[#allocation10 + $0xd0] ss:$8 sps:$4 sm:$0xff]   ;;  %v3162_v41 = vld [vmem:[#allocation10 + $0xc4] ss:$8 sps:$4 sm:$0xff]  }
 0x16d   :  { %v2729_v58 = vpop.f32.mrf.mxu0 }
 0x16e   :  { %v715_v61 = vmax.f32 %v683_v46, 0.0  ;;  %v645_v62 = vmul.f32 %v2728_v56, %v3748_v59 }
 0x16f   :  { %v2730_v63 = vpop.f32.mrf.mxu0  ;;  %1223 = vmatpush1.bf16.msra.mxu1 %v3148_v45 }
 0x170   :  { %v2731_v2 = vadd.f32 %v2730_v63, %v2729_v58  ;;  %v741_v3 = vpack.c.bf16 %v715_v61, %v714_v60  ;;  %1224 = vmatprep.subr.bf16.mxu1 %v3153_v57  ;;  %v684_v6 = vadd.f32 %v3751_v0, %v645_v62  ;;  %v3160_v57 = vld [vmem:[#allocation10 + $0xc0] ss:$8 sps:$4 sm:$0xff]   ;;  %v3165_v61 = vld [vmem:[#allocation10 + $0xb4] ss:$8 sps:$4 sm:$0xff]  }
 0x171   :  { %v2732_v5 = vpop.f32.mrf.mxu0 }
 0x172   :  { %v646_v7 = vmul.f32 %v2731_v2, %v3748_v59  ;;  %2971 = vmatmul.mubr.bf16.gmra.mxu1 %v741_v3  ;;  %v716_v14 = vmax.f32 %v684_v6, 0.0 }
 0x173   :  { %v2733_v8 = vpop.f32.mrf.mxu0  ;;  %1225 = vmatpush2.bf16.msra.mxu1 %v3151_v1 }
 0x174   :  { %v685_v10 = vadd.f32 %v3751_v0, %v646_v7  ;;  %v2734_v11 = vadd.f32 %v2733_v8, %v2732_v5  ;;  %1226 = vmatprep.subr.bf16.mxu1 %v3156_v4  ;;  %v3163_v4 = vld [vmem:[#allocation10 + $0xb0] ss:$8 sps:$4 sm:$0xff]   ;;  %v3168_v7 = vld [vmem:[#allocation10 + $0xa4] ss:$8 sps:$4 sm:$0xff]  }
 0x175   :  { %v2735_v13 = vpop.f32.mrf.mxu0 }
 0x176   :  { %v717_v15 = vmax.f32 %v685_v10, 0.0  ;;  %v647_v16 = vmul.f32 %v2734_v11, %v3748_v59 }
 0x177   :  { %v2736_v21 = vpop.f32.mrf.mxu0  ;;  %1227 = vmatpush2.bf16.msra.mxu1 %v3154_v9 }
 0x178   :  { %v2737_v37 = vadd.f32 %v2736_v21, %v2735_v13  ;;  %v742_v38 = vpack.c.bf16 %v717_v15, %v716_v14  ;;  %1228 = vmatprep.subr.bf16.mxu1 %v3159_v12  ;;  %v686_v45 = vadd.f32 %v3751_v0, %v647_v16  ;;  %v3166_v12 = vld [vmem:[#allocation10 + $0xa0] ss:$8 sps:$4 sm:$0xff]   ;;  %v3171_v15 = vld [vmem:[#allocation10 + $0x94] ss:$8 sps:$4 sm:$0xff]  }
 0x179   :  { %v2738_v42 = vpop.f32.mrf.mxu0 }
 0x17a   :  { %v648_v46 = vmul.f32 %v2737_v37, %v3748_v59  ;;  %2974 = vmatprep.mubr.bf16.mxu1 %v742_v38  ;;  %v718_v63 = vmax.f32 %v686_v45, 0.0 }
 0x17b   :  { %v2739_v56 = vpop.f32.mrf.mxu0  ;;  %1229 = vmatpush2.bf16.msra.mxu1 %v3157_v22 }
 0x17c   :  { %v687_v58 = vadd.f32 %v3751_v0, %v648_v46  ;;  %v2740_v60 = vadd.f32 %v2739_v56, %v2738_v42  ;;  %1230 = vmatprep.subr.bf16.mxu1 %v3162_v41  ;;  %v3169_v41 = vld [vmem:[#allocation10 + $0x90] ss:$8 sps:$4 sm:$0xff]   ;;  %v3174_v46 = vld [vmem:[#allocation10 + $0x84] ss:$8 sps:$4 sm:$0xff]  }
 0x17d   :  { %v2741_v62 = vpop.f32.mrf.mxu0 }
 0x17e   :  { %v719_v1 = vmax.f32 %v687_v58, 0.0  ;;  %v649_v2 = vmul.f32 %v2740_v60, %v3748_v59 }
 0x17f   :  { %v2742_v3 = vpop.f32.mrf.mxu0  ;;  %1231 = vmatpush2.bf16.msra.mxu1 %v3160_v57 }
 0x180   :  { %v2743_v5 = vadd.f32 %v2742_v3, %v2741_v62  ;;  %v743_v6 = vpack.c.bf16 %v719_v1, %v718_v63  ;;  %1232 = vmatprep.subr.bf16.mxu1 %v3165_v61  ;;  %v688_v9 = vadd.f32 %v3751_v0, %v649_v2  ;;  %v3172_v61 = vld [vmem:[#allocation10 + $0x80] ss:$8 sps:$4 sm:$0xff]  }
 0x181   :  { %v2744_v8 = vpop.f32.mrf.mxu0 }
 0x182   :  { %v650_v10 = vmul.f32 %v2743_v5, %v3748_v59  ;;  %2975 = vmatmul.mubr.bf16.gmra.mxu1 %v743_v6  ;;  %v720_v21 = vmax.f32 %v688_v9, 0.0 }
 0x183   :  { %v2745_v11 = vpop.f32.mrf.mxu0  ;;  %1233 = vmatpush2.bf16.msra.mxu1 %v3163_v4 }
 0x184   :  { %v689_v13 = vadd.f32 %v3751_v0, %v650_v10  ;;  %v2746_v14 = vadd.f32 %v2745_v11, %v2744_v8  ;;  %1234 = vmatprep.subr.bf16.mxu1 %v3168_v7 }
 0x185   :  { %v2747_v16 = vpop.f32.mrf.mxu0 }
 0x186   :  { %v721_v22 = vmax.f32 %v689_v13, 0.0  ;;  %v651_v37 = vmul.f32 %v2746_v14, %v3748_v59 }
 0x187   :  { %v2748_v38 = vpop.f32.mrf.mxu0  ;;  %1235 = vmatpush2.bf16.msra.mxu1 %v3166_v12 }
 0x188   :  { %v2749_v42 = vadd.f32 %v2748_v38, %v2747_v16  ;;  %v744_v45 = vpack.c.bf16 %v721_v22, %v720_v21  ;;  %1236 = vmatprep.subr.bf16.mxu1 %v3171_v15  ;;  %v690_v57 = vadd.f32 %v3751_v0, %v651_v37 }
 0x189   :  { %v2750_v56 = vpop.f32.mrf.mxu0 }
 0x18a   :  { %v652_v58 = vmul.f32 %v2749_v42, %v3748_v59  ;;  %2978 = vmatprep.mubr.bf16.mxu1 %v744_v45  ;;  %v722_v2 = vmax.f32 %v690_v57, 0.0  ;;  %v3176_v57 = vld [vmem:[#allocation11 + $0x38] sm:$0xff]  }
 0x18b   :  { %v2751_v60 = vpop.f32.mrf.mxu0  ;;  %1237 = vmatpush2.bf16.msra.mxu1 %v3169_v41 }
 0x18c   :  { %v691_v62 = vadd.f32 %v3751_v0, %v652_v58  ;;  %v2752_v63 = vadd.f32 %v2751_v60, %v2750_v56  ;;  %1238 = vmatprep.subr.bf16.mxu1 %v3174_v46  ;;  %v3175_v56 = vld [vmem:[#allocation11 + $0x78] sm:$0xff]  }
 0x18d   :  { %v2753_v1 = vpop.f32.mrf.mxu0  ;;  %2810 = vmatprep.subr.bf16.mxu0 %v3175_v56 }
 0x18e   :  { %v723_v3 = vmax.f32 %v691_v62, 0.0  ;;  %v653_v4 = vmul.f32 %v2752_v63, %v3748_v59  ;;  %2811 = vmatpush3.bf16.msra.mxu0 %v3176_v57 }
 0x18f   :  { %v2754_v5 = vpop.f32.mrf.mxu0  ;;  %1239 = vmatpush2.bf16.msra.mxu1 %v3172_v61 }
 0x190   :  { %v2755_v6 = vadd.f32 %v2754_v5, %v2753_v1  ;;  %v745_v7 = vpack.c.bf16 %v723_v3, %v722_v2  ;;  %v692_v9 = vadd.f32 %v3751_v0, %v653_v4 }
 0x191   :  { %v2756_v8 = vpop.f32.mrf.mxu0 }
 0x192   :  { %v654_v10 = vmul.f32 %v2755_v6, %v3748_v59  ;;  %2979 = vmatmul.mubr.bf16.gmra.mxu1 %v745_v7  ;;  %v724_v15 = vmax.f32 %v692_v9, 0.0 }
 0x193   :  { %v2757_v11 = vpop.f32.mrf.mxu0 }
 0x194   :  { %v693_v12 = vadd.f32 %v3751_v0, %v654_v10  ;;  %v2758_v13 = vadd.f32 %v2757_v11, %v2756_v8 }
 0x195   :  { %v2759_v14 = vpop.f32.mrf.mxu0 }
 0x196   :  { %v725_v16 = vmax.f32 %v693_v12, 0.0  ;;  %v655_v21 = vmul.f32 %v2758_v13, %v3748_v59 }
 0x197   :  { %v2760_v22 = vpop.f32.mrf.mxu0 }
 0x198   :  { %v2761_v37 = vadd.f32 %v2760_v22, %v2759_v14  ;;  %v746_v38 = vpack.c.bf16 %v725_v16, %v724_v15  ;;  %v694_v42 = vadd.f32 %v3751_v0, %v655_v21 }
 0x199   :  { %v2762_v41 = vpop.f32.mrf.mxu0 }
 0x19a   :  { %v656_v45 = vmul.f32 %v2761_v37, %v3748_v59  ;;  %2982 = vmatprep.mubr.bf16.mxu1 %v746_v38  ;;  %v726_v62 = vmax.f32 %v694_v42, 0.0  ;;  %v3177_v42 = vld [vmem:[#allocation11 + $0x70] sm:$0xff]  }
 0x19b   :  { %v2763_v46 = vpop.f32.mrf.mxu0  ;;  %2812 = vmatprep.subr.bf16.mxu0 %v3177_v42 }
 0x19c   :  { %v695_v58 = vadd.f32 %v3751_v0, %v656_v45  ;;  %v2764_v60 = vadd.f32 %v2763_v46, %v2762_v41  ;;  %v3178_v45 = vld [vmem:[#allocation11 + $0x30] sm:$0xff]  }
 0x19d   :  { %v2765_v61 = vpop.f32.mrf.mxu0  ;;  %2813 = vmatpush3.bf16.msra.mxu0 %v3178_v45  ;;  %v3327_v45 = vld [vmem:[#allocation2 + $0x4] ss:$8 sps:$4 sm:$0xff]  }
 0x19e   :  { %v727_v63 = vmax.f32 %v695_v58, 0.0  ;;  %v657_v1 = vmul.f32 %v2764_v60, %v3748_v59 }
 0x19f   :  { %v2766_v2 = vpop.f32.mrf.mxu0 }
 0x1a0   :  { %v2767_v3 = vadd.f32 %v2766_v2, %v2765_v61  ;;  %v747_v4 = vpack.c.bf16 %v727_v63, %v726_v62  ;;  %v696_v6 = vadd.f32 %v3751_v0, %v657_v1 }
 0x1a1   :  { %v2768_v5 = vpop.f32.mrf.mxu0 }
 0x1a2   :  { %v658_v7 = vmul.f32 %v2767_v3, %v3748_v59  ;;  %2983 = vmatmul.mubr.bf16.gmra.mxu1 %v747_v4  ;;  %v728_v12 = vmax.f32 %v696_v6, 0.0 }
 0x1a3   :  { %v2769_v8 = vpop.f32.mrf.mxu0 }
 0x1a4   :  { %v697_v9 = vadd.f32 %v3751_v0, %v658_v7  ;;  %v2770_v10 = vadd.f32 %v2769_v8, %v2768_v5 }
 0x1a5   :  { %v2771_v11 = vpop.f32.mrf.mxu0 }
 0x1a6   :  { %v729_v13 = vmax.f32 %v697_v9, 0.0  ;;  %v659_v14 = vmul.f32 %v2770_v10, %v3748_v59 }
 0x1a7   :  { %v2772_v15 = vpop.f32.mrf.mxu0 }
 0x1a8   :  { %v2773_v16 = vadd.f32 %v2772_v15, %v2771_v11  ;;  %v748_v21 = vpack.c.bf16 %v729_v13, %v728_v12  ;;  %v698_v37 = vadd.f32 %v3751_v0, %v659_v14 }
 0x1a9   :  { %v2774_v22 = vpop.f32.mrf.mxu0 }
 0x1aa   :  { %v660_v38 = vmul.f32 %v2773_v16, %v3748_v59  ;;  %2986 = vmatprep.mubr.bf16.mxu1 %v748_v21  ;;  %v730_v58 = vmax.f32 %v698_v37, 0.0  ;;  %v3179_v21 = vld [vmem:[#allocation11 + $0x68] sm:$0xff]  }
 0x1ab   :  { %v2775_v41 = vpop.f32.mrf.mxu0  ;;  %2814 = vmatprep.subr.bf16.mxu0 %v3179_v21 }
 0x1ac   :  { %v699_v46 = vadd.f32 %v3751_v0, %v660_v38  ;;  %v2776_v56 = vadd.f32 %v2775_v41, %v2774_v22  ;;  %v3180_v22 = vld [vmem:[#allocation11 + $0x28] sm:$0xff]  }
 0x1ad   :  { %v2777_v57 = vpop.f32.mrf.mxu0  ;;  %2815 = vmatpush3.bf16.msra.mxu0 %v3180_v22 }
 0x1ae   :  { %v731_v60 = vmax.f32 %v699_v46, 0.0  ;;  %v661_v61 = vmul.f32 %v2776_v56, %v3748_v59  ;;  %v3181_v46 = vld [vmem:[#allocation11 + $0x60] sm:$0xff]  }
 0x1af   :  { %v2778_v62 = vpop.f32.mrf.mxu0  ;;  %v3182_v56 = vld [vmem:[#allocation11 + $0x20] sm:$0xff]   ;;  %2816 = vmatprep.subr.bf16.mxu0 %v3181_v46 }
 0x1b0   :  { %v2779_v63 = vadd.f32 %v2778_v62, %v2777_v57  ;;  %v749_v1 = vpack.c.bf16 %v731_v60, %v730_v58  ;;  %v700_v3 = vadd.f32 %v3751_v0, %v661_v61 }
 0x1b1   :  { %v2780_v2 = vpop.f32.mrf.mxu0  ;;  %2817 = vmatpush3.bf16.msra.mxu0 %v3182_v56 }
 0x1b2   :  { %v662_v4 = vmul.f32 %v2779_v63, %v3748_v59  ;;  %2987 = vmatmul.mubr.bf16.gmra.mxu1 %v749_v1  ;;  %v732_v9 = vmax.f32 %v700_v3, 0.0 }
 0x1b3   :  { %v2781_v5 = vpop.f32.mrf.mxu0 }
 0x1b4   :  { %v701_v6 = vadd.f32 %v3751_v0, %v662_v4  ;;  %v2782_v7 = vadd.f32 %v2781_v5, %v2780_v2 }
 0x1b5   :  { %v2783_v8 = vpop.f32.mrf.mxu0 }
 0x1b6   :  { %v733_v10 = vmax.f32 %v701_v6, 0.0  ;;  %v663_v11 = vmul.f32 %v2782_v7, %v3748_v59 }
 0x1b7   :  { %v2784_v12 = vpop.f32.mrf.mxu0 }
 0x1b8   :  { %v2785_v13 = vadd.f32 %v2784_v12, %v2783_v8  ;;  %v750_v14 = vpack.c.bf16 %v733_v10, %v732_v9  ;;  %v702_v15 = vadd.f32 %v3751_v0, %v663_v11 }
 0x1ba   :  { %v664_v16 = vmul.f32 %v2785_v13, %v3748_v59  ;;  %2990 = vmatprep.mubr.bf16.mxu1 %v750_v14  ;;  %v734_v38 = vmax.f32 %v702_v15, 0.0  ;;  %v3183_v59 = vld [vmem:[#allocation11 + $0x58] sm:$0xff]  }
 0x1bb   :  { %2818 = vmatprep.subr.bf16.mxu0 %v3183_v59 }
 0x1bc   :  { %v703_v37 = vadd.f32 %v3751_v0, %v664_v16  ;;  %v3184_v0 = vld [vmem:[#allocation11 + $0x18] sm:$0xff]  }
 0x1bd   :  { %2819 = vmatpush3.bf16.msra.mxu0 %v3184_v0  ;;  %v1403_v0 = vlaneseq }
 0x1be   :  { %v735_v41 = vmax.f32 %v703_v37, 0.0 }
 0x1c0   :  { %v751_v42 = vpack.c.bf16 %v735_v41, %v734_v38 }
 0x1c2   :  { %2991 = vmatmul.mubr.bf16.gmra.mxu1 %v751_v42 }
 0x1c3   :  { %1240 = vmatprep.mubr.bf16.mxu1 %v3327_v45 }
 0x1ca   :  { %1241 = vmatmul.mubr.bf16.vlgmr.msra.gmra.mxu1 %v3652_v17  ;;  %v3185_v17 = vld [vmem:[#allocation11 + $0x50] sm:$0xff]  }
 0x1cb   :  { %1250 = vmatprep.mubr.bf16.mxu1 %v3654_v18  ;;  %v3186_v18 = vld [vmem:[#allocation11 + $0x10] sm:$0xff]   ;;  %2820 = vmatprep.subr.bf16.mxu0 %v3185_v17 }
 0x1cc   :  { %2821 = vmatpush3.bf16.msra.mxu0 %v3186_v18  ;;  %v1404_v18 = vshrl.u32 %v1403_v0, 7 }
 0x1d2   :  { %1251 = vmatmul.mubr.bf16.gmra.mxu1 %v3658_v19  ;;  %v3187_v19 = vld [vmem:[#allocation11 + $0x48] sm:$0xff]  }
 0x1d3   :  { %1260 = vmatprep.mubr.bf16.mxu1 %v3660_v20  ;;  %v3188_v20 = vld [vmem:[#allocation11 + $0x8] sm:$0xff]   ;;  %2822 = vmatprep.subr.bf16.mxu0 %v3187_v19 }
 0x1d4   :  { %2823 = vmatpush3.bf16.msra.mxu0 %v3188_v20 }
 0x1da   :  { %1261 = vmatmul.mubr.bf16.gmra.mxu1 %v3664_v23  ;;  %v3189_v23 = vld [vmem:[#allocation11 + $0x40] sm:$0xff]  }
 0x1db   :  { %1270 = vmatprep.mubr.bf16.mxu1 %v3666_v24  ;;  %2824 = vmatprep.subr.bf16.mxu0 %v3189_v23  ;;  %v3190_v24 = vld [vmem:[#allocation11] sm:$0xff]  }
 0x1dc   :  { %2825 = vmatpush3.bf16.msra.mxu0 %v3190_v24  ;;  %v1409_v24 = vsub.s32 1, %v1404_v18 }
 0x1e2   :  { %1271 = vmatmul.mubr.bf16.gmra.mxu1 %v3670_v25  ;;  %v3837_v25 = vld [vmem:[%s4154_s5] ss:$0 sm:$0xff] }
 0x1e3   :  { %1280 = vmatprep.mubr.bf16.mxu1 %v3672_v26 }
 0x1ea   :  { %1281 = vmatmul.mubr.bf16.gmra.mxu1 %v3676_v27 }
 0x1eb   :  { %1290 = vmatprep.mubr.bf16.mxu1 %v3678_v28 }
 0x1f2   :  { %1291 = vmatmul.mubr.bf16.gmra.mxu1 %v3682_v29 }
 0x1f3   :  { %1300 = vmatprep.mubr.bf16.mxu1 %v3684_v30 }
 0x1fa   :  { %1301 = vmatmul.mubr.bf16.gmra.mxu1 %v3688_v31 }
 0x1fb   :  { %1310 = vmatprep.mubr.bf16.mxu1 %v3690_v32 }
 0x202   :  { %1311 = vmatmul.mubr.bf16.gmra.mxu1 %v3694_v33 }
 0x203   :  { %1320 = vmatprep.mubr.bf16.mxu1 %v3696_v34 }
 0x20a   :  { %1321 = vmatmul.mubr.bf16.gmra.mxu1 %v3700_v35 }
 0x20b   :  { %1330 = vmatprep.mubr.bf16.mxu1 %v3702_v36 }
 0x212   :  { %v2964_v26 = vpop.f32.mrf.mxu1  ;;  %1331 = vmatmul.mubr.bf16.gmra.mxu1 %v3706_v39 }
 0x213   :  { %v866_v27 = vadd.f32 %v2964_v26, %v3837_v25  ;;  %1340 = vmatprep.mubr.bf16.mxu1 %v3708_v40 }
 0x214   :  { %v857_v28 = vpop.f32.mrf.mxu1 }
 0x215   :  { %986 = vst [vmem:[#allocation14 + $0x10] sm:$0xff] %v866_v27  ;;  %v858_v29 = vadd.f32 %v3837_v25, %v857_v28  ;;  %v1405_v27 = vsub.s32 0, %v1404_v18 }
 0x216   :  { %v2965_v30 = vpop.f32.mrf.mxu1 }
 0x217   :  { %984 = vst [vmem:[#allocation14] sm:$0xff] %v858_v29  ;;  %v869_v31 = vadd.f32 %v2965_v30, %v3837_v25  ;;  %v1401_v29 = vld [vmem:[%s4156_s7] sm:$0x3] }
 0x218   :  { %v860_v32 = vpop.f32.mrf.mxu1 }
 0x219   :  { %987 = vst [vmem:[#allocation14 + $0x18] sm:$0xff] %v869_v31  ;;  %v861_v33 = vadd.f32 %v3837_v25, %v860_v32  ;;  %v3887_v32 = vrot.slane %v1401_v29, %v1409_v24 }
 0x21a   :  { %1341 = vmatmul.mubr.bf16.gmra.mxu1 %v3712_v43 }
 0x21b   :  { %985 = vst [vmem:[#allocation14 + $0x8] sm:$0xff] %v861_v33  ;;  %1350 = vmatprep.mubr.bf16.mxu1 %v3714_v44 }
 0x222   :  { %v2968_v34 = vpop.f32.mrf.mxu1  ;;  %1351 = vmatmul.mubr.bf16.gmra.mxu1 %v3718_v47 }
 0x223   :  { %v882_v35 = vadd.f32 %v2968_v34, %v3837_v25  ;;  %1360 = vmatprep.mubr.bf16.mxu1 %v3720_v48  ;;  %v3889_v34 = vrot.slane %v1401_v29, %v1405_v27 }
 0x224   :  { %v873_v36 = vpop.f32.mrf.mxu1 }
 0x225   :  { %990 = vst [vmem:[#allocation14 + $0x30] sm:$0xff] %v882_v35  ;;  %v874_v39 = vadd.f32 %v3837_v25, %v873_v36  ;;  %v1477_v35 = vld [vmem:[%s4157_s8] sm:$0x3] }
 0x226   :  { %v2969_v40 = vpop.f32.mrf.mxu1 }
 0x227   :  { %988 = vst [vmem:[#allocation14 + $0x20] sm:$0xff] %v874_v39  ;;  %v885_v57 = vadd.f32 %v2969_v40, %v3837_v25  ;;  %v3895_v40 = vrot.slane %v1477_v35, %v1409_v24 }
 0x228   :  { %v876_v58 = vpop.f32.mrf.mxu1 }
 0x229   :  { %991 = vst [vmem:[#allocation14 + $0x38] sm:$0xff] %v885_v57  ;;  %v877_v43 = vadd.f32 %v3837_v25, %v876_v58  ;;  %v3898_v58 = vrot.slane %v1477_v35, %v1405_v27 }
 0x22a   :  { %1361 = vmatmul.mubr.bf16.gmra.mxu1 %v3724_v49 }
 0x22b   :  { %989 = vst [vmem:[#allocation14 + $0x28] sm:$0xff] %v877_v43  ;;  %1370 = vmatprep.mubr.bf16.mxu1 %v3726_v50 }
 0x232   :  { %v2972_v44 = vpop.f32.mrf.mxu1  ;;  %1371 = vmatmul.mubr.bf16.gmra.mxu1 %v3730_v51 }
 0x233   :  { %v898_v47 = vadd.f32 %v2972_v44, %v3837_v25  ;;  %1380 = vmatprep.mubr.bf16.mxu1 %v3732_v52 }
 0x234   :  { %v889_v48 = vpop.f32.mrf.mxu1 }
 0x235   :  { %994 = vst [vmem:[#allocation14 + $0x50] sm:$0xff] %v898_v47  ;;  %v890_v60 = vadd.f32 %v3837_v25, %v889_v48 }
 0x236   :  { %v2973_v61 = vpop.f32.mrf.mxu1 }
 0x237   :  { %992 = vst [vmem:[#allocation14 + $0x40] sm:$0xff] %v890_v60  ;;  %v901_v62 = vadd.f32 %v2973_v61, %v3837_v25 }
 0x238   :  { %v892_v63 = vpop.f32.mrf.mxu1 }
 0x239   :  { %995 = vst [vmem:[#allocation14 + $0x58] sm:$0xff] %v901_v62  ;;  %v893_v49 = vadd.f32 %v3837_v25, %v892_v63  ;;  %v3191_v63 = vld [vmem:[#allocation13 + $0x38] sm:$0xff]  }
 0x23a   :  { %1381 = vmatmul.mubr.bf16.gmra.mxu1 %v3736_v53  ;;  %2994 = vmatprep.subr.bf16.mxu1 %v3191_v63 }
 0x23b   :  { %993 = vst [vmem:[#allocation14 + $0x48] sm:$0xff] %v893_v49  ;;  %1390 = vmatprep.mubr.bf16.mxu1 %v3738_v54  ;;  %v3192_v49 = vld [vmem:[#allocation13 + $0x30] sm:$0xff]   ;;  %2995 = vmatpush3.bf16.msra.mxu1 %v3191_v63 }
 0x23c   :  { %2996 = vmatprep.subr.bf16.mxu1 %v3192_v49 }
 0x23f   :  { %2997 = vmatpush3.bf16.msra.mxu1 %v3192_v49 }
 0x242   :  { %v2976_v50 = vpop.f32.mrf.mxu1  ;;  %1391 = vmatmul.mubr.bf16.gmra.mxu1 %v3742_v55 }
 0x243   :  { %v914_v51 = vadd.f32 %v2976_v50, %v3837_v25 }
 0x244   :  { %v905_v52 = vpop.f32.mrf.mxu1 }
 0x245   :  { %998 = vst [vmem:[#allocation14 + $0x70] sm:$0xff] %v914_v51  ;;  %v906_v1 = vadd.f32 %v3837_v25, %v905_v52 }
 0x246   :  { %v2977_v2 = vpop.f32.mrf.mxu1 }
 0x247   :  { %996 = vst [vmem:[#allocation14 + $0x60] sm:$0xff] %v906_v1  ;;  %v917_v3 = vadd.f32 %v2977_v2, %v3837_v25 }
 0x248   :  { %v908_v4 = vpop.f32.mrf.mxu1 }
 0x249   :  { %999 = vst [vmem:[#allocation14 + $0x78] sm:$0xff] %v917_v3  ;;  %v909_v53 = vadd.f32 %v3837_v25, %v908_v4 }
 0x24b   :  { %997 = vst [vmem:[#allocation14 + $0x68] sm:$0xff] %v909_v53 }
 0x252   :  { %v2980_v5 = vpop.f32.mrf.mxu1 }
 0x253   :  { %v930_v54 = vadd.f32 %v2980_v5, %v3837_v25 }
 0x254   :  { %v921_v6 = vpop.f32.mrf.mxu1 }
 0x255   :  { %1002 = vst [vmem:[#allocation14 + $0x90] sm:$0xff] %v930_v54  ;;  %v922_v55 = vadd.f32 %v3837_v25, %v921_v6  ;;  %v3193_v54 = vld [vmem:[#allocation13 + $0x28] sm:$0xff]  }
 0x256   :  { %v2981_v7 = vpop.f32.mrf.mxu1  ;;  %2998 = vmatprep.subr.bf16.mxu1 %v3193_v54 }
 0x257   :  { %1000 = vst [vmem:[#allocation14 + $0x80] sm:$0xff] %v922_v55  ;;  %v933_v8 = vadd.f32 %v2981_v7, %v3837_v25  ;;  %2999 = vmatpush3.bf16.msra.mxu1 %v3193_v54 }
 0x258   :  { %v924_v9 = vpop.f32.mrf.mxu1 }
 0x259   :  { %1003 = vst [vmem:[#allocation14 + $0x98] sm:$0xff] %v933_v8  ;;  %v925_v10 = vadd.f32 %v3837_v25, %v924_v9 }
 0x25b   :  { %1001 = vst [vmem:[#allocation14 + $0x88] sm:$0xff] %v925_v10 }
 0x262   :  { %v2984_v11 = vpop.f32.mrf.mxu1 }
 0x263   :  { %v946_v12 = vadd.f32 %v2984_v11, %v3837_v25 }
 0x264   :  { %v937_v13 = vpop.f32.mrf.mxu1 }
 0x265   :  { %1006 = vst [vmem:[#allocation14 + $0xb0] sm:$0xff] %v946_v12  ;;  %v938_v14 = vadd.f32 %v3837_v25, %v937_v13 }
 0x266   :  { %v2985_v15 = vpop.f32.mrf.mxu1 }
 0x267   :  { %1004 = vst [vmem:[#allocation14 + $0xa0] sm:$0xff] %v938_v14  ;;  %v949_v16 = vadd.f32 %v2985_v15, %v3837_v25 }
 0x268   :  { %v940_v21 = vpop.f32.mrf.mxu1 }
 0x269   :  { %1007 = vst [vmem:[#allocation14 + $0xb8] sm:$0xff] %v949_v16  ;;  %v941_v22 = vadd.f32 %v3837_v25, %v940_v21 }
 0x26b   :  { %1005 = vst [vmem:[#allocation14 + $0xa8] sm:$0xff] %v941_v22 }
 0x272   :  { %v2988_v37 = vpop.f32.mrf.mxu1 }
 0x273   :  { %v962_v38 = vadd.f32 %v2988_v37, %v3837_v25 }
 0x274   :  { %v953_v41 = vpop.f32.mrf.mxu1 }
 0x275   :  { %1010 = vst [vmem:[#allocation14 + $0xd0] sm:$0xff] %v962_v38  ;;  %v954_v42 = vadd.f32 %v3837_v25, %v953_v41 }
 0x276   :  { %v2989_v45 = vpop.f32.mrf.mxu1 }
 0x277   :  { %1008 = vst [vmem:[#allocation14 + $0xc0] sm:$0xff] %v954_v42  ;;  %v965_v46 = vadd.f32 %v2989_v45, %v3837_v25 }
 0x278   :  { %v956_v56 = vpop.f32.mrf.mxu1 }
 0x279   :  { %1011 = vst [vmem:[#allocation14 + $0xd8] sm:$0xff] %v965_v46  ;;  %v957_v59 = vadd.f32 %v3837_v25, %v956_v56 }
 0x27b   :  { %1009 = vst [vmem:[#allocation14 + $0xc8] sm:$0xff] %v957_v59 }
 0x282   :  { %v2992_v17 = vpop.f32.mrf.mxu1 }
 0x283   :  { %v978_v19 = vadd.f32 %v2992_v17, %v3837_v25 }
 0x284   :  { %v969_v20 = vpop.f32.mrf.mxu1 }
 0x285   :  { %1014 = vst [vmem:[#allocation14 + $0xf0] sm:$0xff] %v978_v19  ;;  %v970_v23 = vadd.f32 %v3837_v25, %v969_v20 }
 0x286   :  { %v2993_v26 = vpop.f32.mrf.mxu1 }
 0x287   :  { %1012 = vst [vmem:[#allocation14 + $0xe0] sm:$0xff] %v970_v23  ;;  %v981_v28 = vadd.f32 %v2993_v26, %v3837_v25 }
 0x288   :  { %v972_v30 = vpop.f32.mrf.mxu1 }
 0x289   :  { %1015 = vst [vmem:[#allocation14 + $0xf8] sm:$0xff] %v981_v28  ;;  %v973_v31 = vadd.f32 %v3837_v25, %v972_v30 }
 0x28a   :  { %v1242_v33 = vpop.f32.mrf.mxu1 }
 0x28b   :  { %1013 = vst [vmem:[#allocation14 + $0xe8] sm:$0xff] %v973_v31  ;;  %v1413_v57 = vmul.f32 %v3889_v34, %v1242_v33 }
 0x28c   :  { %v1244_v36 = vpop.f32.mrf.mxu1 }
 0x28d   :  { %v1414_v39 = vmul.f32 %v3887_v32, %v1244_v36  ;;  %v1489_v61 = vadd.f32 %v3898_v58, %v1413_v57 }
 0x28e   :  { %v1246_v25 = vpop.f32.mrf.mxu1 }
 0x28f   :  { %v1415_v43 = vmul.f32 %v3889_v34, %v1246_v25  ;;  %v1490_v47 = vadd.f32 %v3895_v40, %v1414_v39  ;;  %v1553_v4 = vmax.f32 %v1489_v61, 0.0 }
 0x290   :  { %v1248_v44 = vpop.f32.mrf.mxu1 }
 0x291   :  { %v1491_v48 = vadd.f32 %v3898_v58, %v1415_v43  ;;  %v1416_v60 = vmul.f32 %v3887_v32, %v1248_v44  ;;  %v1554_v1 = vmax.f32 %v1490_v47, 0.0 }
 0x292   :  { %v1252_v62 = vpop.f32.mrf.mxu1 }
 0x293   :  { %v1492_v50 = vadd.f32 %v3895_v40, %v1416_v60  ;;  %v1555_v51 = vmax.f32 %v1491_v48, 0.0  ;;  %v1417_v53 = vmul.f32 %v3889_v34, %v1252_v62 }
 0x294   :  { %v1254_v52 = vpop.f32.mrf.mxu1 }
 0x295   :  { %v1556_v2 = vmax.f32 %v1492_v50, 0.0  ;;  %v1418_v3 = vmul.f32 %v3887_v32, %v1254_v52  ;;  %v1617_v7 = vpack.c.bf16 %v1555_v51, %v1553_v4  ;;  %v1493_v12 = vadd.f32 %v3898_v58, %v1417_v53 }
 0x296   :  { %v1256_v5 = vpop.f32.mrf.mxu1 }
 0x297   :  { %v1419_v6 = vmul.f32 %v3889_v34, %v1256_v5  ;;  %v1618_v55 = vpack.c.bf16 %v1556_v2, %v1554_v1  ;;  %v1494_v9 = vadd.f32 %v3895_v40, %v1418_v3  ;;  %v1557_v38 = vmax.f32 %v1493_v12, 0.0 }
 0x298   :  { %v1258_v8 = vpop.f32.mrf.mxu1 }
 0x299   :  { %v1495_v10 = vadd.f32 %v3898_v58, %v1419_v6  ;;  %v1420_v11 = vmul.f32 %v3887_v32, %v1258_v8  ;;  %1809 = vmatprep.mubr.bf16.mxu0 %v1618_v55  ;;  %v1558_v21 = vmax.f32 %v1494_v9, 0.0 }
 0x29a   :  { %v1262_v13 = vpop.f32.mrf.mxu1  ;;  %1810 = vmatmul.mubr.bf16.vlgmr.msra.gmra.mxu0 %v1617_v7 }
 0x29b   :  { %v1496_v14 = vadd.f32 %v3895_v40, %v1420_v11  ;;  %v1559_v15 = vmax.f32 %v1495_v10, 0.0  ;;  %v1421_v41 = vmul.f32 %v3889_v34, %v1262_v13 }
 0x29c   :  { %v1264_v16 = vpop.f32.mrf.mxu1 }
 0x29d   :  { %v1560_v22 = vmax.f32 %v1496_v14, 0.0  ;;  %v1422_v37 = vmul.f32 %v3887_v32, %v1264_v16  ;;  %v1619_v59 = vpack.c.bf16 %v1559_v15, %v1557_v38  ;;  %v1497_v19 = vadd.f32 %v3898_v58, %v1421_v41 }
 0x29e   :  { %v1266_v42 = vpop.f32.mrf.mxu1 }
 0x29f   :  { %v1423_v45 = vmul.f32 %v3889_v34, %v1266_v42  ;;  %v1620_v46 = vpack.c.bf16 %v1560_v22, %v1558_v21  ;;  %v1498_v0 = vadd.f32 %v3895_v40, %v1422_v37  ;;  %v1561_v30 = vmax.f32 %v1497_v19, 0.0 }
 0x2a0   :  { %v1268_v56 = vpop.f32.mrf.mxu1 }
 0x2a1   :  { %v1499_v17 = vadd.f32 %v3898_v58, %v1423_v45  ;;  %v1424_v18 = vmul.f32 %v3887_v32, %v1268_v56  ;;  %1817 = vmatprep.mubr.bf16.mxu0 %v1620_v46  ;;  %v1562_v27 = vmax.f32 %v1498_v0, 0.0 }
 0x2a2   :  { %v1272_v20 = vpop.f32.mrf.mxu1  ;;  %1818 = vmatmul.mubr.bf16.gmra.mxu0 %v1619_v59 }
 0x2a3   :  { %v1500_v23 = vadd.f32 %v3895_v40, %v1424_v18  ;;  %v1563_v24 = vmax.f32 %v1499_v17, 0.0  ;;  %v1425_v31 = vmul.f32 %v3889_v34, %v1272_v20 }
 0x2a4   :  { %v1274_v26 = vpop.f32.mrf.mxu1 }
 0x2a5   :  { %v1564_v28 = vmax.f32 %v1500_v23, 0.0  ;;  %v1426_v29 = vmul.f32 %v3887_v32, %v1274_v26  ;;  %v1621_v57 = vpack.c.bf16 %v1563_v24, %v1561_v30  ;;  %v1501_v47 = vadd.f32 %v3898_v58, %v1425_v31 }
 0x2a6   :  { %v1276_v33 = vpop.f32.mrf.mxu1 }
 0x2a7   :  { %v1427_v35 = vmul.f32 %v3889_v34, %v1276_v33  ;;  %v1622_v36 = vpack.c.bf16 %v1564_v28, %v1562_v27  ;;  %v1502_v25 = vadd.f32 %v3895_v40, %v1426_v29  ;;  %v1565_v51 = vmax.f32 %v1501_v47, 0.0 }
 0x2a8   :  { %v1278_v39 = vpop.f32.mrf.mxu1 }
 0x2a9   :  { %v1503_v43 = vadd.f32 %v3898_v58, %v1427_v35  ;;  %v1428_v44 = vmul.f32 %v3887_v32, %v1278_v39  ;;  %1825 = vmatprep.mubr.bf16.mxu0 %v1622_v36  ;;  %v1566_v63 = vmax.f32 %v1502_v25, 0.0 }
 0x2aa   :  { %v1282_v48 = vpop.f32.mrf.mxu1  ;;  %1826 = vmatmul.mubr.bf16.gmra.mxu0 %v1621_v57 }
 0x2ab   :  { %v1504_v60 = vadd.f32 %v3895_v40, %v1428_v44  ;;  %v1567_v61 = vmax.f32 %v1503_v43, 0.0  ;;  %v1429_v52 = vmul.f32 %v3889_v34, %v1282_v48 }
 0x2ac   :  { %v1284_v62 = vpop.f32.mrf.mxu1 }
 0x2ad   :  { %v1568_v49 = vmax.f32 %v1504_v60, 0.0  ;;  %v1430_v50 = vmul.f32 %v3887_v32, %v1284_v62  ;;  %v1623_v53 = vpack.c.bf16 %v1567_v61, %v1565_v51  ;;  %v1505_v55 = vadd.f32 %v3898_v58, %v1429_v52 }
 0x2ae   :  { %v1286_v1 = vpop.f32.mrf.mxu1 }
 0x2af   :  { %v1431_v2 = vmul.f32 %v3889_v34, %v1286_v1  ;;  %v1624_v3 = vpack.c.bf16 %v1568_v49, %v1566_v63  ;;  %v1506_v5 = vadd.f32 %v3895_v40, %v1430_v50  ;;  %v1569_v14 = vmax.f32 %v1505_v55, 0.0 }
 0x2b0   :  { %v1288_v4 = vpop.f32.mrf.mxu1 }
 0x2b1   :  { %v1507_v54 = vadd.f32 %v3898_v58, %v1431_v2  ;;  %v1432_v6 = vmul.f32 %v3887_v32, %v1288_v4  ;;  %1833 = vmatprep.mubr.bf16.mxu0 %v1624_v3  ;;  %v1570_v11 = vmax.f32 %v1506_v5, 0.0 }
 0x2b2   :  { %v1292_v7 = vpop.f32.mrf.mxu1  ;;  %1834 = vmatmul.mubr.bf16.gmra.mxu0 %v1623_v53 }
 0x2b3   :  { %v1508_v8 = vadd.f32 %v3895_v40, %v1432_v6  ;;  %v1571_v9 = vmax.f32 %v1507_v54, 0.0  ;;  %v1433_v15 = vmul.f32 %v3889_v34, %v1292_v7 }
 0x2b4   :  { %v1294_v10 = vpop.f32.mrf.mxu1 }
 0x2b5   :  { %v1572_v12 = vmax.f32 %v1508_v8, 0.0  ;;  %v1434_v13 = vmul.f32 %v3887_v32, %v1294_v10  ;;  %v1625_v38 = vpack.c.bf16 %v1571_v9, %v1569_v14  ;;  %v1509_v46 = vadd.f32 %v3898_v58, %v1433_v15 }
 0x2b6   :  { %v1296_v16 = vpop.f32.mrf.mxu1 }
 0x2b7   :  { %v1435_v21 = vmul.f32 %v3889_v34, %v1296_v16  ;;  %v1626_v22 = vpack.c.bf16 %v1572_v12, %v1570_v11  ;;  %v1510_v41 = vadd.f32 %v3895_v40, %v1434_v13  ;;  %v1573_v23 = vmax.f32 %v1509_v46, 0.0 }
 0x2b8   :  { %v1298_v37 = vpop.f32.mrf.mxu1 }
 0x2b9   :  { %v1511_v42 = vadd.f32 %v3898_v58, %v1435_v21  ;;  %v1436_v45 = vmul.f32 %v3887_v32, %v1298_v37  ;;  %1841 = vmatprep.mubr.bf16.mxu0 %v1626_v22  ;;  %v1574_v18 = vmax.f32 %v1510_v41, 0.0 }
 0x2ba   :  { %v1302_v56 = vpop.f32.mrf.mxu1  ;;  %1842 = vmatmul.mubr.bf16.gmra.mxu0 %v1625_v38 }
 0x2bb   :  { %v1512_v59 = vadd.f32 %v3895_v40, %v1436_v45  ;;  %v1575_v0 = vmax.f32 %v1511_v42, 0.0  ;;  %v1437_v24 = vmul.f32 %v3889_v34, %v1302_v56 }
 0x2bc   :  { %v1304_v17 = vpop.f32.mrf.mxu1 }
 0x2bd   :  { %v1576_v19 = vmax.f32 %v1512_v59, 0.0  ;;  %v1438_v20 = vmul.f32 %v3887_v32, %v1304_v17  ;;  %v1627_v30 = vpack.c.bf16 %v1575_v0, %v1573_v23  ;;  %v1513_v36 = vadd.f32 %v3898_v58, %v1437_v24 }
 0x2be   :  { %v1306_v26 = vpop.f32.mrf.mxu1 }
 0x2bf   :  { %v1439_v27 = vmul.f32 %v3889_v34, %v1306_v26  ;;  %v1628_v28 = vpack.c.bf16 %v1576_v19, %v1574_v18  ;;  %v1514_v31 = vadd.f32 %v3895_v40, %v1438_v20  ;;  %v1577_v60 = vmax.f32 %v1513_v36, 0.0 }
 0x2c0   :  { %v1308_v29 = vpop.f32.mrf.mxu1 }
 0x2c1   :  { %v1515_v33 = vadd.f32 %v3898_v58, %v1439_v27  ;;  %v1440_v35 = vmul.f32 %v3887_v32, %v1308_v29  ;;  %1849 = vmatprep.mubr.bf16.mxu0 %v1628_v28  ;;  %v1578_v44 = vmax.f32 %v1514_v31, 0.0 }
 0x2c2   :  { %v1312_v39 = vpop.f32.mrf.mxu1  ;;  %1850 = vmatmul.mubr.bf16.gmra.mxu0 %v1627_v30  ;;  %v3194_v30 = vld [vmem:[#allocation13 + $0x20] sm:$0xff]  }
 0x2c3   :  { %v1516_v57 = vadd.f32 %v3895_v40, %v1440_v35  ;;  %v1579_v25 = vmax.f32 %v1515_v33, 0.0  ;;  %v1441_v61 = vmul.f32 %v3889_v34, %v1312_v39  ;;  %3000 = vmatprep.subr.bf16.mxu1 %v3194_v30 }
 0x2c4   :  { %v1314_v43 = vpop.f32.mrf.mxu1  ;;  %3001 = vmatpush3.bf16.msra.mxu1 %v3194_v30 }
 0x2c5   :  { %v1580_v47 = vmax.f32 %v1516_v57, 0.0  ;;  %v1442_v48 = vmul.f32 %v3887_v32, %v1314_v43  ;;  %v1629_v51 = vpack.c.bf16 %v1579_v25, %v1577_v60  ;;  %v1517_v3 = vadd.f32 %v3898_v58, %v1441_v61 }
 0x2c6   :  { %v1316_v62 = vpop.f32.mrf.mxu1 }
 0x2c7   :  { %v1443_v63 = vmul.f32 %v3889_v34, %v1316_v62  ;;  %v1630_v49 = vpack.c.bf16 %v1580_v47, %v1578_v44  ;;  %v1518_v52 = vadd.f32 %v3895_v40, %v1442_v48  ;;  %v1581_v8 = vmax.f32 %v1517_v3, 0.0 }
 0x2c8   :  { %v1318_v50 = vpop.f32.mrf.mxu1 }
 0x2c9   :  { %v1519_v1 = vadd.f32 %v3898_v58, %v1443_v63  ;;  %v1444_v2 = vmul.f32 %v3887_v32, %v1318_v50  ;;  %1857 = vmatprep.mubr.bf16.mxu0 %v1630_v49  ;;  %v1582_v6 = vmax.f32 %v1518_v52, 0.0  ;;  %v3195_v50 = vld [vmem:[#allocation13 + $0x18] sm:$0xff]  }
 0x2ca   :  { %v1322_v4 = vpop.f32.mrf.mxu1  ;;  %1858 = vmatmul.mubr.bf16.gmra.mxu0 %v1629_v51  ;;  %3002 = vmatprep.subr.bf16.mxu1 %v3195_v50 }
 0x2cb   :  { %v1520_v53 = vadd.f32 %v3895_v40, %v1444_v2  ;;  %v1583_v5 = vmax.f32 %v1519_v1, 0.0  ;;  %v1445_v9 = vmul.f32 %v3889_v34, %v1322_v4  ;;  %3003 = vmatpush3.bf16.msra.mxu1 %v3195_v50 }
 0x2cc   :  { %v1324_v54 = vpop.f32.mrf.mxu1 }
 0x2cd   :  { %v1584_v55 = vmax.f32 %v1520_v53, 0.0  ;;  %v1446_v7 = vmul.f32 %v3887_v32, %v1324_v54  ;;  %v1631_v14 = vpack.c.bf16 %v1583_v5, %v1581_v8  ;;  %v1521_v22 = vadd.f32 %v3898_v58, %v1445_v9  ;;  %v3196_v54 = vld [vmem:[#allocation13 + $0x10] sm:$0xff]  }
 0x2ce   :  { %v1326_v10 = vpop.f32.mrf.mxu1  ;;  %3004 = vmatprep.subr.bf16.mxu1 %v3196_v54 }
 0x2cf   :  { %v1447_v11 = vmul.f32 %v3889_v34, %v1326_v10  ;;  %v1632_v12 = vpack.c.bf16 %v1584_v55, %v1582_v6  ;;  %v1522_v15 = vadd.f32 %v3895_v40, %v1446_v7  ;;  %v1585_v59 = vmax.f32 %v1521_v22, 0.0  ;;  %3005 = vmatpush3.bf16.msra.mxu1 %v3196_v54 }
 0x2d0   :  { %v1328_v13 = vpop.f32.mrf.mxu1 }
 0x2d1   :  { %v1523_v16 = vadd.f32 %v3898_v58, %v1447_v11  ;;  %v1448_v21 = vmul.f32 %v3887_v32, %v1328_v13  ;;  %1865 = vmatprep.mubr.bf16.mxu0 %v1632_v12  ;;  %v1586_v45 = vmax.f32 %v1522_v15, 0.0  ;;  %v3197_v15 = vld [vmem:[#allocation13 + $0x8] sm:$0xff]  }
 0x2d2   :  { %v1332_v37 = vpop.f32.mrf.mxu1  ;;  %1866 = vmatmul.mubr.bf16.gmra.mxu0 %v1631_v14  ;;  %3006 = vmatprep.subr.bf16.mxu1 %v3197_v15 }
 0x2d3   :  { %v1524_v38 = vadd.f32 %v3895_v40, %v1448_v21  ;;  %v1587_v41 = vmax.f32 %v1523_v16, 0.0  ;;  %v1449_v0 = vmul.f32 %v3889_v34, %v1332_v37  ;;  %3007 = vmatpush3.bf16.msra.mxu1 %v3197_v15 }
 0x2d4   :  { %v1334_v42 = vpop.f32.mrf.mxu1 }
 0x2d5   :  { %v1588_v46 = vmax.f32 %v1524_v38, 0.0  ;;  %v1450_v56 = vmul.f32 %v3887_v32, %v1334_v42  ;;  %v1633_v23 = vpack.c.bf16 %v1587_v41, %v1585_v59  ;;  %v1525_v28 = vadd.f32 %v3898_v58, %v1449_v0 }
 0x2d6   :  { %v1336_v17 = vpop.f32.mrf.mxu1 }
 0x2d7   :  { %v1451_v18 = vmul.f32 %v3889_v34, %v1336_v17  ;;  %v1634_v19 = vpack.c.bf16 %v1588_v46, %v1586_v45  ;;  %v1526_v24 = vadd.f32 %v3895_v40, %v1450_v56  ;;  %v1589_v25 = vmax.f32 %v1525_v28, 0.0  ;;  %v3198_v46 = vld [vmem:[#allocation13] sm:$0xff]  }
 0x2d8   :  { %v1338_v20 = vpop.f32.mrf.mxu1  ;;  %3008 = vmatprep.subr.bf16.mxu1 %v3198_v46 }
 0x2d9   :  { %v1527_v26 = vadd.f32 %v3898_v58, %v1451_v18  ;;  %v1452_v27 = vmul.f32 %v3887_v32, %v1338_v20  ;;  %1873 = vmatprep.mubr.bf16.mxu0 %v1634_v19  ;;  %v1590_v36 = vmax.f32 %v1526_v24, 0.0  ;;  %3009 = vmatpush3.bf16.msra.mxu1 %v3198_v46 }
 0x2da   :  { %v1342_v29 = vpop.f32.mrf.mxu1  ;;  %1874 = vmatmul.mubr.bf16.gmra.mxu0 %v1633_v23 }
 0x2db   :  { %v1528_v31 = vadd.f32 %v3895_v40, %v1452_v27  ;;  %v1591_v33 = vmax.f32 %v1527_v26, 0.0  ;;  %v1453_v43 = vmul.f32 %v3889_v34, %v1342_v29 }
 0x2dc   :  { %v1344_v35 = vpop.f32.mrf.mxu1 }
 0x2dd   :  { %v1592_v39 = vmax.f32 %v1528_v31, 0.0  ;;  %v1454_v57 = vmul.f32 %v3887_v32, %v1344_v35  ;;  %v1635_v61 = vpack.c.bf16 %v1591_v33, %v1589_v25  ;;  %v1529_v51 = vadd.f32 %v3898_v58, %v1453_v43 }
 0x2de   :  { %v1346_v44 = vpop.f32.mrf.mxu1 }
 0x2df   :  { %v1455_v47 = vmul.f32 %v3889_v34, %v1346_v44  ;;  %v1636_v48 = vpack.c.bf16 %v1592_v39, %v1590_v36  ;;  %v1530_v62 = vadd.f32 %v3895_v40, %v1454_v57  ;;  %v1593_v6 = vmax.f32 %v1529_v51, 0.0 }
 0x2e0   :  { %v1348_v60 = vpop.f32.mrf.mxu1 }
 0x2e1   :  { %v1531_v63 = vadd.f32 %v3898_v58, %v1455_v47  ;;  %v1456_v49 = vmul.f32 %v3887_v32, %v1348_v60  ;;  %1881 = vmatprep.mubr.bf16.mxu0 %v1636_v48  ;;  %v1594_v4 = vmax.f32 %v1530_v62, 0.0 }
 0x2e2   :  { %v1352_v52 = vpop.f32.mrf.mxu1  ;;  %1882 = vmatmul.mubr.bf16.gmra.mxu0 %v1635_v61 }
 0x2e3   :  { %v1532_v1 = vadd.f32 %v3895_v40, %v1456_v49  ;;  %v1595_v2 = vmax.f32 %v1531_v63, 0.0  ;;  %v1457_v55 = vmul.f32 %v3889_v34, %v1352_v52 }
 0x2e4   :  { %v1354_v3 = vpop.f32.mrf.mxu1 }
 0x2e5   :  { %v1596_v53 = vmax.f32 %v1532_v1, 0.0  ;;  %v1458_v5 = vmul.f32 %v3887_v32, %v1354_v3  ;;  %v1637_v11 = vpack.c.bf16 %v1595_v2, %v1593_v6  ;;  %v1533_v16 = vadd.f32 %v3898_v58, %v1457_v55 }
 0x2e6   :  { %v1356_v7 = vpop.f32.mrf.mxu1 }
 0x2e7   :  { %v1459_v8 = vmul.f32 %v3889_v34, %v1356_v7  ;;  %v1638_v9 = vpack.c.bf16 %v1596_v53, %v1594_v4  ;;  %v1534_v12 = vadd.f32 %v3895_v40, %v1458_v5  ;;  %v1597_v56 = vmax.f32 %v1533_v16, 0.0 }
 0x2e8   :  { %v1358_v10 = vpop.f32.mrf.mxu1 }
 0x2e9   :  { %v1535_v13 = vadd.f32 %v3898_v58, %v1459_v8  ;;  %v1460_v14 = vmul.f32 %v3887_v32, %v1358_v10  ;;  %1889 = vmatprep.mubr.bf16.mxu0 %v1638_v9  ;;  %v1598_v41 = vmax.f32 %v1534_v12, 0.0 }
 0x2ea   :  { %v1362_v21 = vpop.f32.mrf.mxu1  ;;  %1890 = vmatmul.mubr.bf16.gmra.mxu0 %v1637_v11 }
 0x2eb   :  { %v1536_v22 = vadd.f32 %v3895_v40, %v1460_v14  ;;  %v1599_v37 = vmax.f32 %v1535_v13, 0.0  ;;  %v1461_v59 = vmul.f32 %v3889_v34, %v1362_v21 }
 0x2ec   :  { %v1364_v38 = vpop.f32.mrf.mxu1 }
 0x2ed   :  { %v1600_v42 = vmax.f32 %v1536_v22, 0.0  ;;  %v1462_v45 = vmul.f32 %v3887_v32, %v1364_v38  ;;  %v1639_v20 = vpack.c.bf16 %v1599_v37, %v1597_v56  ;;  %v1537_v27 = vadd.f32 %v3898_v58, %v1461_v59 }
 0x2ee   :  { %v1366_v0 = vpop.f32.mrf.mxu1 }
 0x2ef   :  { %v1463_v17 = vmul.f32 %v3889_v34, %v1366_v0  ;;  %v1640_v18 = vpack.c.bf16 %v1600_v42, %v1598_v41  ;;  %v1538_v23 = vadd.f32 %v3895_v40, %v1462_v45  ;;  %v1601_v39 = vmax.f32 %v1537_v27, 0.0 }
 0x2f0   :  { %v1368_v19 = vpop.f32.mrf.mxu1 }
 0x2f1   :  { %v1539_v24 = vadd.f32 %v3898_v58, %v1463_v17  ;;  %v1464_v26 = vmul.f32 %v3887_v32, %v1368_v19  ;;  %1897 = vmatprep.mubr.bf16.mxu0 %v1640_v18  ;;  %v1602_v33 = vmax.f32 %v1538_v23, 0.0 }
 0x2f2   :  { %v1372_v28 = vpop.f32.mrf.mxu1  ;;  %1898 = vmatmul.mubr.bf16.gmra.mxu0 %v1639_v20 }
 0x2f3   :  { %v1540_v29 = vadd.f32 %v3895_v40, %v1464_v26  ;;  %v1603_v30 = vmax.f32 %v1539_v24, 0.0  ;;  %v1465_v57 = vmul.f32 %v3889_v34, %v1372_v28 }
 0x2f4   :  { %v1374_v31 = vpop.f32.mrf.mxu1 }
 0x2f5   :  { %v1604_v35 = vmax.f32 %v1540_v29, 0.0  ;;  %v1466_v36 = vmul.f32 %v3887_v32, %v1374_v31  ;;  %v1641_v47 = vpack.c.bf16 %v1603_v30, %v1601_v39  ;;  %v1541_v63 = vadd.f32 %v3898_v58, %v1465_v57 }
 0x2f6   :  { %v1376_v25 = vpop.f32.mrf.mxu1 }
 0x2f7   :  { %v1467_v43 = vmul.f32 %v3889_v34, %v1376_v25  ;;  %v1642_v44 = vpack.c.bf16 %v1604_v35, %v1602_v33  ;;  %v1542_v60 = vadd.f32 %v3895_v40, %v1466_v36  ;;  %v1605_v4 = vmax.f32 %v1541_v63, 0.0 }
 0x2f8   :  { %v1378_v48 = vpop.f32.mrf.mxu1 }
 0x2f9   :  { %v1543_v61 = vadd.f32 %v3898_v58, %v1467_v43  ;;  %v1468_v62 = vmul.f32 %v3887_v32, %v1378_v48  ;;  %1905 = vmatprep.mubr.bf16.mxu0 %v1642_v44  ;;  %v1606_v1 = vmax.f32 %v1542_v60, 0.0 }
 0x2fa   :  { %v1382_v49 = vpop.f32.mrf.mxu1  ;;  %1906 = vmatmul.mubr.bf16.gmra.mxu0 %v1641_v47 }
 0x2fb   :  { %v1544_v50 = vadd.f32 %v3895_v40, %v1468_v62  ;;  %v1607_v51 = vmax.f32 %v1543_v61, 0.0  ;;  %v1469_v53 = vmul.f32 %v3889_v34, %v1382_v49 }
 0x2fc   :  { %v1384_v52 = vpop.f32.mrf.mxu1 }
 0x2fd   :  { %v1608_v2 = vmax.f32 %v1544_v50, 0.0  ;;  %v1470_v3 = vmul.f32 %v3887_v32, %v1384_v52  ;;  %v1643_v55 = vpack.c.bf16 %v1607_v51, %v1605_v4  ;;  %v1545_v11 = vadd.f32 %v3898_v58, %v1469_v53 }
 0x2fe   :  { %v1386_v5 = vpop.f32.mrf.mxu1 }
 0x2ff   :  { %v1471_v54 = vmul.f32 %v3889_v34, %v1386_v5  ;;  %v1644_v6 = vpack.c.bf16 %v1608_v2, %v1606_v1  ;;  %v1546_v8 = vadd.f32 %v3895_v40, %v1470_v3  ;;  %v1609_v37 = vmax.f32 %v1545_v11, 0.0 }
 0x300   :  { %v1388_v7 = vpop.f32.mrf.mxu1 }
 0x301   :  { %v1547_v9 = vadd.f32 %v3898_v58, %v1471_v54  ;;  %v1472_v10 = vmul.f32 %v3887_v32, %v1388_v7  ;;  %1913 = vmatprep.mubr.bf16.mxu0 %v1644_v6  ;;  %v1610_v16 = vmax.f32 %v1546_v8, 0.0 }
 0x302   :  { %v1392_v12 = vpop.f32.mrf.mxu1  ;;  %1914 = vmatmul.mubr.bf16.gmra.mxu0 %v1643_v55 }
 0x303   :  { %v1548_v13 = vadd.f32 %v3895_v40, %v1472_v10  ;;  %v1611_v14 = vmax.f32 %v1547_v9, 0.0  ;;  %v1473_v38 = vmul.f32 %v3889_v34, %v1392_v12 }
 0x304   :  { %v1394_v15 = vpop.f32.mrf.mxu1 }
 0x305   :  { %v1612_v21 = vmax.f32 %v1548_v13, 0.0  ;;  %v1474_v22 = vmul.f32 %v3887_v32, %v1394_v15  ;;  %v1645_v46 = vpack.c.bf16 %v1611_v14, %v1609_v37  ;;  %v1549_v18 = vadd.f32 %v3898_v58, %v1473_v38 }
 0x306   :  { %v1396_v41 = vpop.f32.mrf.mxu1 }
 0x307   :  { %v1475_v42 = vmul.f32 %v3889_v34, %v1396_v41  ;;  %v1646_v45 = vpack.c.bf16 %v1612_v21, %v1610_v16  ;;  %v1550_v59 = vadd.f32 %v3895_v40, %v1474_v22  ;;  %v1613_v26 = vmax.f32 %v1549_v18, 0.0 }
 0x308   :  { %v1398_v56 = vpop.f32.mrf.mxu1 }
 0x309   :  { %v1551_v0 = vadd.f32 %v3898_v58, %v1475_v42  ;;  %v1476_v17 = vmul.f32 %v3887_v32, %v1398_v56  ;;  %1921 = vmatprep.mubr.bf16.mxu0 %v1646_v45  ;;  %v1614_v23 = vmax.f32 %v1550_v59, 0.0  ;;  %v4029_v32 = vld [vmem:[%s4159_s10] ss:$0 sm:$0xff] }
 0x30a   :  { %1922 = vmatmul.mubr.bf16.gmra.mxu0 %v1645_v46 }
 0x30b   :  { %v1552_v19 = vadd.f32 %v3895_v40, %v1476_v17  ;;  %v1615_v20 = vmax.f32 %v1551_v0, 0.0  ;;  %v4035_v40 = vld [vmem:[%s4160_s11] ss:$0 sm:$0xff] }
 0x30d   :  { %v1616_v24 = vmax.f32 %v1552_v19, 0.0  ;;  %v1647_v27 = vpack.c.bf16 %v1615_v20, %v1613_v26 }
 0x30f   :  { %v1648_v34 = vpack.c.bf16 %v1616_v24, %v1614_v23 }
 0x311   :  { %1929 = vmatprep.mubr.bf16.mxu0 %v1648_v34 }
 0x312   :  { %1930 = vmatmul.mubr.bf16.gmra.mxu0 %v1647_v27 }
 0x35a   :  { %v2826_v28 = vpop.f32.mrf.mxu0 }
 0x35c   :  { %v2827_v29 = vpop.f32.mrf.mxu0 }
 0x35d   :  { %v2828_v30 = vadd.f32 %v2827_v29, %v2826_v28 }
 0x35e   :  { %v2829_v58 = vpop.f32.mrf.mxu0 }
 0x35f   :  { %v1945_v31 = vmul.f32 %v2828_v30, %v4029_v32 }
 0x360   :  { %v2830_v33 = vpop.f32.mrf.mxu0 }
 0x361   :  { %v2831_v35 = vadd.f32 %v2830_v33, %v2829_v58  ;;  %v1984_v39 = vadd.f32 %v4035_v40, %v1945_v31 }
 0x362   :  { %v2832_v36 = vpop.f32.mrf.mxu0 }
 0x363   :  { %v1946_v57 = vmul.f32 %v2831_v35, %v4029_v32  ;;  %v2016_v48 = vmax.f32 %v1984_v39, 0.0 }
 0x364   :  { %v2833_v25 = vpop.f32.mrf.mxu0 }
 0x365   :  { %v1985_v43 = vadd.f32 %v4035_v40, %v1946_v57  ;;  %v2834_v44 = vadd.f32 %v2833_v25, %v2832_v36 }
 0x366   :  { %v2835_v47 = vpop.f32.mrf.mxu0 }
 0x367   :  { %v2017_v60 = vmax.f32 %v1985_v43, 0.0  ;;  %v1947_v61 = vmul.f32 %v2834_v44, %v4029_v32 }
 0x368   :  { %v2836_v62 = vpop.f32.mrf.mxu0 }
 0x369   :  { %v2837_v63 = vadd.f32 %v2836_v62, %v2835_v47  ;;  %v2048_v49 = vpack.c.bf16 %v2017_v60, %v2016_v48  ;;  %v1986_v51 = vadd.f32 %v4035_v40, %v1947_v61 }
 0x36a   :  { %v2838_v50 = vpop.f32.mrf.mxu0 }
 0x36b   :  { %v1948_v52 = vmul.f32 %v2837_v63, %v4029_v32  ;;  %3010 = vmatprep.mubr.bf16.mxu1 %v2048_v49  ;;  %v2018_v53 = vmax.f32 %v1986_v51, 0.0 }
 0x36c   :  { %v2839_v1 = vpop.f32.mrf.mxu0 }
 0x36d   :  { %v1987_v2 = vadd.f32 %v4035_v40, %v1948_v52  ;;  %v2840_v3 = vadd.f32 %v2839_v1, %v2838_v50 }
 0x36e   :  { %v2841_v4 = vpop.f32.mrf.mxu0 }
 0x36f   :  { %v2019_v5 = vmax.f32 %v1987_v2, 0.0  ;;  %v1949_v54 = vmul.f32 %v2840_v3, %v4029_v32 }
 0x370   :  { %v2842_v6 = vpop.f32.mrf.mxu0 }
 0x371   :  { %v2049_v55 = vpack.c.bf16 %v2019_v5, %v2018_v53  ;;  %v2843_v7 = vadd.f32 %v2842_v6, %v2841_v4  ;;  %v1988_v9 = vadd.f32 %v4035_v40, %v1949_v54 }
 0x372   :  { %v2844_v8 = vpop.f32.mrf.mxu0 }
 0x373   :  { %v1950_v10 = vmul.f32 %v2843_v7, %v4029_v32  ;;  %3011 = vmatmul.mubr.bf16.vlgmr.msra.gmra.mxu1 %v2049_v55  ;;  %v2020_v15 = vmax.f32 %v1988_v9, 0.0 }
 0x374   :  { %v2845_v11 = vpop.f32.mrf.mxu0 }
 0x375   :  { %v1989_v12 = vadd.f32 %v4035_v40, %v1950_v10  ;;  %v2846_v13 = vadd.f32 %v2845_v11, %v2844_v8 }
 0x376   :  { %v2847_v14 = vpop.f32.mrf.mxu0 }
 0x377   :  { %v2021_v16 = vmax.f32 %v1989_v12, 0.0  ;;  %v1951_v21 = vmul.f32 %v2846_v13, %v4029_v32 }
 0x378   :  { %v2848_v22 = vpop.f32.mrf.mxu0 }
 0x379   :  { %v2849_v37 = vadd.f32 %v2848_v22, %v2847_v14  ;;  %v2050_v38 = vpack.c.bf16 %v2021_v16, %v2020_v15  ;;  %v1990_v42 = vadd.f32 %v4035_v40, %v1951_v21 }
 0x37a   :  { %v2850_v41 = vpop.f32.mrf.mxu0 }
 0x37b   :  { %v1952_v45 = vmul.f32 %v2849_v37, %v4029_v32  ;;  %3014 = vmatprep.mubr.bf16.mxu1 %v2050_v38  ;;  %v2022_v17 = vmax.f32 %v1990_v42, 0.0 }
 0x37c   :  { %v2851_v46 = vpop.f32.mrf.mxu0 }
 0x37d   :  { %v1991_v56 = vadd.f32 %v4035_v40, %v1952_v45  ;;  %v2852_v59 = vadd.f32 %v2851_v46, %v2850_v41 }
 0x37e   :  { %v2853_v0 = vpop.f32.mrf.mxu0 }
 0x37f   :  { %v2023_v18 = vmax.f32 %v1991_v56, 0.0  ;;  %v1953_v19 = vmul.f32 %v2852_v59, %v4029_v32 }
 0x380   :  { %v2854_v20 = vpop.f32.mrf.mxu0 }
 0x381   :  { %v2855_v23 = vadd.f32 %v2854_v20, %v2853_v0  ;;  %v2051_v24 = vpack.c.bf16 %v2023_v18, %v2022_v17  ;;  %v1992_v34 = vadd.f32 %v4035_v40, %v1953_v19 }
 0x382   :  { %v2856_v26 = vpop.f32.mrf.mxu0 }
 0x383   :  { %v1954_v27 = vmul.f32 %v2855_v23, %v4029_v32  ;;  %3015 = vmatmul.mubr.bf16.gmra.mxu1 %v2051_v24  ;;  %v2024_v31 = vmax.f32 %v1992_v34, 0.0 }
 0x384   :  { %v2857_v28 = vpop.f32.mrf.mxu0 }
 0x385   :  { %v1993_v29 = vadd.f32 %v4035_v40, %v1954_v27  ;;  %v2858_v30 = vadd.f32 %v2857_v28, %v2856_v26 }
 0x386   :  { %v2859_v58 = vpop.f32.mrf.mxu0 }
 0x387   :  { %v2025_v33 = vmax.f32 %v1993_v29, 0.0  ;;  %v1955_v35 = vmul.f32 %v2858_v30, %v4029_v32 }
 0x388   :  { %v2860_v36 = vpop.f32.mrf.mxu0 }
 0x389   :  { %v2861_v39 = vadd.f32 %v2860_v36, %v2859_v58  ;;  %v2052_v57 = vpack.c.bf16 %v2025_v33, %v2024_v31  ;;  %v1994_v43 = vadd.f32 %v4035_v40, %v1955_v35 }
 0x38a   :  { %v2862_v25 = vpop.f32.mrf.mxu0 }
 0x38b   :  { %v1956_v44 = vmul.f32 %v2861_v39, %v4029_v32  ;;  %3018 = vmatprep.mubr.bf16.mxu1 %v2052_v57  ;;  %v2026_v62 = vmax.f32 %v1994_v43, 0.0 }
 0x38c   :  { %v2863_v47 = vpop.f32.mrf.mxu0 }
 0x38d   :  { %v1995_v48 = vadd.f32 %v4035_v40, %v1956_v44  ;;  %v2864_v60 = vadd.f32 %v2863_v47, %v2862_v25 }
 0x38e   :  { %v2865_v61 = vpop.f32.mrf.mxu0 }
 0x38f   :  { %v2027_v63 = vmax.f32 %v1995_v48, 0.0  ;;  %v1957_v49 = vmul.f32 %v2864_v60, %v4029_v32 }
 0x390   :  { %v2866_v50 = vpop.f32.mrf.mxu0 }
 0x391   :  { %v2867_v51 = vadd.f32 %v2866_v50, %v2865_v61  ;;  %v2053_v52 = vpack.c.bf16 %v2027_v63, %v2026_v62  ;;  %v1996_v2 = vadd.f32 %v4035_v40, %v1957_v49 }
 0x392   :  { %v2868_v1 = vpop.f32.mrf.mxu0 }
 0x393   :  { %v1958_v3 = vmul.f32 %v2867_v51, %v4029_v32  ;;  %3019 = vmatmul.mubr.bf16.gmra.mxu1 %v2053_v52  ;;  %v2028_v6 = vmax.f32 %v1996_v2, 0.0 }
 0x394   :  { %v2869_v4 = vpop.f32.mrf.mxu0 }
 0x395   :  { %v1997_v53 = vadd.f32 %v4035_v40, %v1958_v3  ;;  %v2870_v5 = vadd.f32 %v2869_v4, %v2868_v1 }
 0x396   :  { %v2871_v54 = vpop.f32.mrf.mxu0 }
 0x397   :  { %v2029_v55 = vmax.f32 %v1997_v53, 0.0  ;;  %v1959_v7 = vmul.f32 %v2870_v5, %v4029_v32 }
 0x398   :  { %v2872_v8 = vpop.f32.mrf.mxu0 }
 0x399   :  { %v2873_v9 = vadd.f32 %v2872_v8, %v2871_v54  ;;  %v2054_v10 = vpack.c.bf16 %v2029_v55, %v2028_v6  ;;  %v1998_v12 = vadd.f32 %v4035_v40, %v1959_v7 }
 0x39a   :  { %v2874_v11 = vpop.f32.mrf.mxu0 }
 0x39b   :  { %v1960_v13 = vmul.f32 %v2873_v9, %v4029_v32  ;;  %3022 = vmatprep.mubr.bf16.mxu1 %v2054_v10  ;;  %v2030_v22 = vmax.f32 %v1998_v12, 0.0 }
 0x39c   :  { %v2875_v14 = vpop.f32.mrf.mxu0 }
 0x39d   :  { %v1999_v15 = vadd.f32 %v4035_v40, %v1960_v13  ;;  %v2876_v16 = vadd.f32 %v2875_v14, %v2874_v11 }
 0x39e   :  { %v2877_v21 = vpop.f32.mrf.mxu0 }
 0x39f   :  { %v2031_v37 = vmax.f32 %v1999_v15, 0.0  ;;  %v1961_v38 = vmul.f32 %v2876_v16, %v4029_v32 }
 0x3a0   :  { %v2878_v41 = vpop.f32.mrf.mxu0 }
 0x3a1   :  { %v2879_v42 = vadd.f32 %v2878_v41, %v2877_v21  ;;  %v2055_v45 = vpack.c.bf16 %v2031_v37, %v2030_v22  ;;  %v2000_v56 = vadd.f32 %v4035_v40, %v1961_v38 }
 0x3a2   :  { %v2880_v46 = vpop.f32.mrf.mxu0 }
 0x3a3   :  { %v1962_v59 = vmul.f32 %v2879_v42, %v4029_v32  ;;  %3023 = vmatmul.mubr.bf16.gmra.mxu1 %v2055_v45  ;;  %v2032_v20 = vmax.f32 %v2000_v56, 0.0 }
 0x3a4   :  { %v2881_v0 = vpop.f32.mrf.mxu0 }
 0x3a5   :  { %v2001_v17 = vadd.f32 %v4035_v40, %v1962_v59  ;;  %v2882_v18 = vadd.f32 %v2881_v0, %v2880_v46 }
 0x3a6   :  { %v2883_v19 = vpop.f32.mrf.mxu0 }
 0x3a7   :  { %v2033_v23 = vmax.f32 %v2001_v17, 0.0  ;;  %v1963_v24 = vmul.f32 %v2882_v18, %v4029_v32 }
 0x3a8   :  { %v2884_v26 = vpop.f32.mrf.mxu0 }
 0x3a9   :  { %v2885_v34 = vadd.f32 %v2884_v26, %v2883_v19  ;;  %v2056_v27 = vpack.c.bf16 %v2033_v23, %v2032_v20  ;;  %v2002_v29 = vadd.f32 %v4035_v40, %v1963_v24 }
 0x3aa   :  { %v2886_v28 = vpop.f32.mrf.mxu0 }
 0x3ab   :  { %v1964_v30 = vmul.f32 %v2885_v34, %v4029_v32  ;;  %3026 = vmatprep.mubr.bf16.mxu1 %v2056_v27  ;;  %v2034_v36 = vmax.f32 %v2002_v29, 0.0 }
 0x3ac   :  { %v2887_v58 = vpop.f32.mrf.mxu0 }
 0x3ad   :  { %v2003_v31 = vadd.f32 %v4035_v40, %v1964_v30  ;;  %v2888_v33 = vadd.f32 %v2887_v58, %v2886_v28 }
 0x3ae   :  { %v2889_v35 = vpop.f32.mrf.mxu0 }
 0x3af   :  { %v2035_v39 = vmax.f32 %v2003_v31, 0.0  ;;  %v1965_v57 = vmul.f32 %v2888_v33, %v4029_v32 }
 0x3b0   :  { %v2890_v25 = vpop.f32.mrf.mxu0 }
 0x3b1   :  { %v2057_v43 = vpack.c.bf16 %v2035_v39, %v2034_v36  ;;  %v2891_v44 = vadd.f32 %v2890_v25, %v2889_v35  ;;  %v2004_v48 = vadd.f32 %v4035_v40, %v1965_v57 }
 0x3b2   :  { %v2892_v47 = vpop.f32.mrf.mxu0 }
 0x3b3   :  { %v1966_v60 = vmul.f32 %v2891_v44, %v4029_v32  ;;  %3027 = vmatmul.mubr.bf16.gmra.mxu1 %v2057_v43  ;;  %v2036_v50 = vmax.f32 %v2004_v48, 0.0 }
 0x3b4   :  { %v2893_v61 = vpop.f32.mrf.mxu0 }
 0x3b5   :  { %v2005_v62 = vadd.f32 %v4035_v40, %v1966_v60  ;;  %v2894_v63 = vadd.f32 %v2893_v61, %v2892_v47 }
 0x3b6   :  { %v2895_v49 = vpop.f32.mrf.mxu0 }
 0x3b7   :  { %v2037_v51 = vmax.f32 %v2005_v62, 0.0  ;;  %v1967_v52 = vmul.f32 %v2894_v63, %v4029_v32 }
 0x3b8   :  { %v2896_v1 = vpop.f32.mrf.mxu0 }
 0x3b9   :  { %v2897_v2 = vadd.f32 %v2896_v1, %v2895_v49  ;;  %v2058_v3 = vpack.c.bf16 %v2037_v51, %v2036_v50  ;;  %v2006_v53 = vadd.f32 %v4035_v40, %v1967_v52  ;;  %v4103_v52 = vld [vmem:[%s4162_s13] ss:$0 sm:$0xff]  ;;  %s3531_s13 = smov [#allocation14]  }
 0x3ba   :  { %v2898_v4 = vpop.f32.mrf.mxu0  ;;  %s2525_s30 = sshll.u32 %s3531_s13, 4  ;;  %s2526_s30 = int_to_ptr.vmem [resolvable:$true] %s2525_s30 }
 0x3bb   :  { %v1968_v5 = vmul.f32 %v2897_v2, %v4029_v32  ;;  %3030 = vmatprep.mubr.bf16.mxu1 %v2058_v3  ;;  %v2038_v8 = vmax.f32 %v2006_v53, 0.0  ;;  %s3468_s16 = scalar_lea.vmem %s2526_s30, 4096  ;;  %p3473_p8 = scmp.lt.s32.totalorder %s2526_s30, %s2526_s30 }
 0x3bc   :  { %v2899_v54 = vpop.f32.mrf.mxu0  ;;  %p3469_p7 = scmp.ne.s32.totalorder %s2526_s30, %s3468_s16  ;;  %p3474_p9 = scmp.lt.s32.totalorder %s3468_s16, %s3468_s16 }
 0x3bd   :  { %v2007_v6 = vadd.f32 %v4035_v40, %v1968_v5  ;;  %v2900_v55 = vadd.f32 %v2899_v54, %v2898_v4 }
 0x3be   :  { %v2901_v7 = vpop.f32.mrf.mxu0  ;;  %p3475_p10 = por %p3474_p9, %p3473_p8 }
 0x3bf   :  { %v2039_v9 = vmax.f32 %v2007_v6, 0.0  ;;  %v1969_v10 = vmul.f32 %v2900_v55, %v4029_v32 }
 0x3c0   :  { %v2902_v11 = vpop.f32.mrf.mxu0  ;;  %p3476_p11 = pnand %p3475_p10, %p3469_p7 }
 0x3c1   :  { %v2059_v12 = vpack.c.bf16 %v2039_v9, %v2038_v8  ;;  %v2903_v13 = vadd.f32 %v2902_v11, %v2901_v7  ;;  %v2008_v15 = vadd.f32 %v4035_v40, %v1969_v10 }
 0x3c2   :  { %v2904_v14 = vpop.f32.mrf.mxu0 }
 0x3c3   :  { %v1970_v16 = vmul.f32 %v2903_v13, %v4029_v32  ;;  %3031 = vmatmul.mubr.bf16.gmra.mxu1 %v2059_v12  ;;  %v2040_v41 = vmax.f32 %v2008_v15, 0.0 }
 0x3c4   :  { %v2905_v21 = vpop.f32.mrf.mxu0 }
 0x3c5   :  { %v2009_v22 = vadd.f32 %v4035_v40, %v1970_v16  ;;  %v2906_v37 = vadd.f32 %v2905_v21, %v2904_v14 }
 0x3c6   :  { %v2907_v38 = vpop.f32.mrf.mxu0 }
 0x3c7   :  { %v2041_v42 = vmax.f32 %v2009_v22, 0.0  ;;  %v1971_v45 = vmul.f32 %v2906_v37, %v4029_v32 }
 0x3c8   :  { %v2908_v46 = vpop.f32.mrf.mxu0 }
 0x3c9   :  { %v2909_v56 = vadd.f32 %v2908_v46, %v2907_v38  ;;  %v2060_v59 = vpack.c.bf16 %v2041_v42, %v2040_v41  ;;  %v2010_v17 = vadd.f32 %v4035_v40, %v1971_v45 }
 0x3ca   :  { %v2910_v0 = vpop.f32.mrf.mxu0 }
 0x3cb   :  { %v1972_v18 = vmul.f32 %v2909_v56, %v4029_v32  ;;  %3034 = vmatprep.mubr.bf16.mxu1 %v2060_v59  ;;  %v2042_v26 = vmax.f32 %v2010_v17, 0.0 }
 0x3cc   :  { %v2911_v19 = vpop.f32.mrf.mxu0 }
 0x3cd   :  { %v2011_v20 = vadd.f32 %v4035_v40, %v1972_v18  ;;  %v2912_v23 = vadd.f32 %v2911_v19, %v2910_v0 }
 0x3ce   :  { %v2913_v24 = vpop.f32.mrf.mxu0 }
 0x3cf   :  { %v2043_v34 = vmax.f32 %v2011_v20, 0.0  ;;  %v1973_v27 = vmul.f32 %v2912_v23, %v4029_v32 }
 0x3d0   :  { %v2914_v28 = vpop.f32.mrf.mxu0 }
 0x3d1   :  { %v2061_v29 = vpack.c.bf16 %v2043_v34, %v2042_v26  ;;  %v2915_v30 = vadd.f32 %v2914_v28, %v2913_v24  ;;  %v2012_v31 = vadd.f32 %v4035_v40, %v1973_v27 }
 0x3d2   :  { %v2916_v58 = vpop.f32.mrf.mxu0 }
 0x3d3   :  { %v1974_v33 = vmul.f32 %v2915_v30, %v4029_v32  ;;  %3035 = vmatmul.mubr.bf16.gmra.mxu1 %v2061_v29  ;;  %v2044_v25 = vmax.f32 %v2012_v31, 0.0 }
 0x3d4   :  { %v2917_v35 = vpop.f32.mrf.mxu0 }
 0x3d5   :  { %v2013_v36 = vadd.f32 %v4035_v40, %v1974_v33  ;;  %v2918_v39 = vadd.f32 %v2917_v35, %v2916_v58 }
 0x3d6   :  { %v2919_v57 = vpop.f32.mrf.mxu0 }
 0x3d7   :  { %v2045_v43 = vmax.f32 %v2013_v36, 0.0  ;;  %v1975_v44 = vmul.f32 %v2918_v39, %v4029_v32 }
 0x3d8   :  { %v2920_v47 = vpop.f32.mrf.mxu0 }
 0x3d9   :  { %v2921_v48 = vadd.f32 %v2920_v47, %v2919_v57  ;;  %v2062_v60 = vpack.c.bf16 %v2045_v43, %v2044_v25  ;;  %v2014_v61 = vadd.f32 %v4035_v40, %v1975_v44 }
 0x3db   :  { %v1976_v62 = vmul.f32 %v2921_v48, %v4029_v32  ;;  %3038 = vmatprep.mubr.bf16.mxu1 %v2062_v60  ;;  %v2046_v49 = vmax.f32 %v2014_v61, 0.0 }
 0x3dd   :  { %v2015_v63 = vadd.f32 %v4035_v40, %v1976_v62 }
 0x3df   :  { %v2047_v50 = vmax.f32 %v2015_v63, 0.0 }
 0x3e1   :  { %v2063_v51 = vpack.c.bf16 %v2047_v50, %v2046_v49 }
 0x3e3   :  { %3039 = vmatmul.mubr.bf16.gmra.mxu1 %v2063_v51 }
 0x433   :  { %v3012_v1 = vpop.f32.mrf.mxu1 }
 0x434   :  { %v2178_v2 = vadd.f32 %v3012_v1, %v4103_v52 }
 0x435   :  { %v2169_v3 = vpop.f32.mrf.mxu1 }
 0x436   :  { %v2298_v4 = vsub.f32 0.0, %v2178_v2  ;;  %v2170_v53 = vadd.f32 %v4103_v52, %v2169_v3 }
 0x437   :  { %v3013_v32 = vpop.f32.mrf.mxu1 }
 0x438   :  { %v2332_v5 = vmul.f32 1.442695, %v2298_v4  ;;  %v2296_v54 = vsub.f32 0.0, %v2170_v53  ;;  %v2181_v40 = vadd.f32 %v3013_v32, %v4103_v52 }
 0x439   :  { %v2172_v6 = vpop.f32.mrf.mxu1 }
 0x43a   :  { %3199 = vpow2.f32 %v2332_v5  ;;  %v2328_v55 = vmul.f32 1.442695, %v2296_v54  ;;  %v2299_v7 = vsub.f32 0.0, %v2181_v40  ;;  %v2173_v8 = vadd.f32 %v4103_v52, %v2172_v6 }
 0x43c   :  { %3201 = vpow2.f32 %v2328_v55  ;;  %v2334_v9 = vmul.f32 1.442695, %v2299_v7  ;;  %v2297_v10 = vsub.f32 0.0, %v2173_v8 }
 0x43e   :  { %3203 = vpow2.f32 %v2334_v9  ;;  %v2330_v11 = vmul.f32 1.442695, %v2297_v10 }
 0x440   :  { %3205 = vpow2.f32 %v2330_v11 }
 0x443   :  { %v3016_v12 = vpop.f32.mrf.mxu1 }
 0x444   :  { %v2194_v13 = vadd.f32 %v3016_v12, %v4103_v52 }
 0x445   :  { %v2185_v14 = vpop.f32.mrf.mxu1 }
 0x446   :  { %v2302_v15 = vsub.f32 0.0, %v2194_v13  ;;  %v2186_v16 = vadd.f32 %v4103_v52, %v2185_v14 }
 0x447   :  { %v3200_v21 = vpop.eup %3199  ;;  %v3017_v22 = vpop.f32.mrf.mxu1 }
 0x448   :  { %v2394_v37 = vadd.f32 1.0, %v3200_v21  ;;  %v2340_v38 = vmul.f32 1.442695, %v2302_v15  ;;  %v2300_v41 = vsub.f32 0.0, %v2186_v16  ;;  %v2197_v42 = vadd.f32 %v3017_v22, %v4103_v52 }
 0x449   :  { %v3202_v45 = vpop.eup %3201  ;;  %v2188_v46 = vpop.f32.mrf.mxu1 }
 0x44a   :  { %3207 = vrcp.f32 %v2394_v37  ;;  %v2392_v56 = vadd.f32 1.0, %v3202_v45  ;;  %v2336_v59 = vmul.f32 1.442695, %v2300_v41  ;;  %v2303_v0 = vsub.f32 0.0, %v2197_v42 }
 0x44b   :  { %v3204_v17 = vpop.eup %3203  ;;  %3209 = vpow2.f32 %v2340_v38  ;;  %v2189_v18 = vadd.f32 %v4103_v52, %v2188_v46 }
 0x44c   :  { %3211 = vrcp.f32 %v2392_v56  ;;  %v2395_v19 = vadd.f32 1.0, %v3204_v17  ;;  %v2342_v20 = vmul.f32 1.442695, %v2303_v0 }
 0x44d   :  { %v3206_v23 = vpop.eup %3205  ;;  %3213 = vpow2.f32 %v2336_v59  ;;  %v2301_v24 = vsub.f32 0.0, %v2189_v18 }
 0x44e   :  { %3215 = vrcp.f32 %v2395_v19  ;;  %v2393_v26 = vadd.f32 1.0, %v3206_v23 }
 0x44f   :  { %3217 = vpow2.f32 %v2342_v20  ;;  %v2338_v34 = vmul.f32 1.442695, %v2301_v24 }
 0x450   :  { %3219 = vrcp.f32 %v2393_v26 }
 0x451   :  { %3479 = shalt.err (!%p3476_p11)
}
 0x452   :  { %2531 = dma.vmem_to_hbm [thread:$0]  %s2526_s30, 4096, %s4163_s14, [#allocation4], %s3526_s4, %s3526_s4, %s3527_s24   ;;  %3221 = vpow2.f32 %v2338_v34 }
 0x453   :  { %v3020_v27 = vpop.f32.mrf.mxu1  ;;  %s3532_s14 = smov [#allocation15]  }
 0x454   :  { %v2210_v28 = vadd.f32 %v3020_v27, %v4103_v52  ;;  %s2537_s18 = sshll.u32 %s3532_s14, 4  ;;  %s2538_s18 = int_to_ptr.vmem [resolvable:$true] %s2537_s18 }
 0x455   :  { %v2201_v29 = vpop.f32.mrf.mxu1  ;;  %s3488_s0 = scalar_lea.vmem %s2538_s18, 4096  ;;  %p3493_p13 = scmp.lt.s32.totalorder %s2538_s18, %s2538_s18 }
 0x456   :  { %v2306_v30 = vsub.f32 0.0, %v2210_v28  ;;  %v2202_v58 = vadd.f32 %v4103_v52, %v2201_v29  ;;  %p3489_p12 = scmp.ne.s32.totalorder %s2538_s18, %s3488_s0  ;;  %p3494_p0 = scmp.lt.s32.totalorder %s3488_s0, %s3488_s0 }
 0x457   :  { %v3208_v31 = vpop.eup %3207  ;;  %v3021_v33 = vpop.f32.mrf.mxu1 }
 0x458   :  { %v3210_v35 = vpop.eup %3209  ;;  %2490 = vst [vmem:[#allocation15 + $0x10] sm:$0xff] %v3208_v31  ;;  %v2348_v36 = vmul.f32 1.442695, %v2306_v30  ;;  %v2304_v39 = vsub.f32 0.0, %v2202_v58  ;;  %v2213_v57 = vadd.f32 %v3021_v33, %v4103_v52  ;;  %p3495_p1 = por %p3494_p0, %p3493_p13 }
 0x459   :  { %v3212_v25 = vpop.eup %3211  ;;  %v2398_v43 = vadd.f32 1.0, %v3210_v35  ;;  %v2204_v44 = vpop.f32.mrf.mxu1 }
 0x45a   :  { %v3214_v47 = vpop.eup %3213  ;;  %2488 = vst [vmem:[#allocation15] sm:$0xff] %v3212_v25  ;;  %3223 = vpow2.f32 %v2348_v36  ;;  %v2344_v48 = vmul.f32 1.442695, %v2304_v39  ;;  %v2307_v60 = vsub.f32 0.0, %v2213_v57  ;;  %v2205_v61 = vadd.f32 %v4103_v52, %v2204_v44  ;;  %p3496_p2 = pnand %p3495_p1, %p3489_p12 }
 0x45b   :  { %v3216_v62 = vpop.eup %3215  ;;  %3225 = vrcp.f32 %v2398_v43  ;;  %v2396_v63 = vadd.f32 1.0, %v3214_v47 }
 0x45c   :  { %v3218_v49 = vpop.eup %3217  ;;  %2491 = vst [vmem:[#allocation15 + $0x18] sm:$0xff] %v3216_v62  ;;  %3227 = vpow2.f32 %v2344_v48  ;;  %v2350_v50 = vmul.f32 1.442695, %v2307_v60  ;;  %v2305_v51 = vsub.f32 0.0, %v2205_v61 }
 0x45d   :  { %v3220_v1 = vpop.eup %3219  ;;  %3229 = vrcp.f32 %v2396_v63  ;;  %v2399_v2 = vadd.f32 1.0, %v3218_v49 }
 0x45e   :  { %2489 = vst [vmem:[#allocation15 + $0x8] sm:$0xff] %v3220_v1  ;;  %3231 = vpow2.f32 %v2350_v50  ;;  %v2346_v4 = vmul.f32 1.442695, %v2305_v51 }
 0x45f   :  { %v3222_v3 = vpop.eup %3221  ;;  %3233 = vrcp.f32 %v2399_v2 }
 0x460   :  { %v2397_v53 = vadd.f32 1.0, %v3222_v3  ;;  %3235 = vpow2.f32 %v2346_v4 }
 0x462   :  { %3237 = vrcp.f32 %v2397_v53 }
 0x463   :  { %v3024_v32 = vpop.f32.mrf.mxu1 }
 0x464   :  { %v2226_v5 = vadd.f32 %v3024_v32, %v4103_v52 }
 0x465   :  { %v2217_v54 = vpop.f32.mrf.mxu1 }
 0x466   :  { %v2310_v40 = vsub.f32 0.0, %v2226_v5  ;;  %v2218_v6 = vadd.f32 %v4103_v52, %v2217_v54 }
 0x467   :  { %v3224_v55 = vpop.eup %3223  ;;  %v3025_v7 = vpop.f32.mrf.mxu1 }
 0x468   :  { %v3226_v8 = vpop.eup %3225  ;;  %v2402_v9 = vadd.f32 1.0, %v3224_v55  ;;  %v2356_v10 = vmul.f32 1.442695, %v2310_v40  ;;  %v2308_v11 = vsub.f32 0.0, %v2218_v6  ;;  %v2229_v12 = vadd.f32 %v3025_v7, %v4103_v52 }
 0x469   :  { %v3228_v13 = vpop.eup %3227  ;;  %2494 = vst [vmem:[#allocation15 + $0x30] sm:$0xff] %v3226_v8  ;;  %v2220_v14 = vpop.f32.mrf.mxu1 }
 0x46a   :  { %v3230_v15 = vpop.eup %3229  ;;  %3239 = vrcp.f32 %v2402_v9  ;;  %v2400_v16 = vadd.f32 1.0, %v3228_v13  ;;  %v2352_v21 = vmul.f32 1.442695, %v2308_v11  ;;  %v2311_v22 = vsub.f32 0.0, %v2229_v12 }
 0x46b   :  { %v3232_v37 = vpop.eup %3231  ;;  %2492 = vst [vmem:[#allocation15 + $0x20] sm:$0xff] %v3230_v15  ;;  %3241 = vpow2.f32 %v2356_v10  ;;  %v2221_v38 = vadd.f32 %v4103_v52, %v2220_v14 }
 0x46c   :  { %v3234_v41 = vpop.eup %3233  ;;  %3243 = vrcp.f32 %v2400_v16  ;;  %v2403_v42 = vadd.f32 1.0, %v3232_v37  ;;  %v2358_v45 = vmul.f32 1.442695, %v2311_v22 }
 0x46d   :  { %v3236_v46 = vpop.eup %3235  ;;  %2495 = vst [vmem:[#allocation15 + $0x38] sm:$0xff] %v3234_v41  ;;  %3245 = vpow2.f32 %v2352_v21  ;;  %v2309_v56 = vsub.f32 0.0, %v2221_v38 }
 0x46e   :  { %3247 = vrcp.f32 %v2403_v42  ;;  %v2401_v0 = vadd.f32 1.0, %v3236_v46 }
 0x46f   :  { %v3238_v59 = vpop.eup %3237  ;;  %3249 = vpow2.f32 %v2358_v45  ;;  %v2354_v17 = vmul.f32 1.442695, %v2309_v56 }
 0x470   :  { %2493 = vst [vmem:[#allocation15 + $0x28] sm:$0xff] %v3238_v59  ;;  %3251 = vrcp.f32 %v2401_v0 }
 0x471   :  { %3253 = vpow2.f32 %v2354_v17 }
 0x473   :  { %v3028_v18 = vpop.f32.mrf.mxu1 }
 0x474   :  { %v2242_v19 = vadd.f32 %v3028_v18, %v4103_v52 }
 0x475   :  { %v2233_v20 = vpop.f32.mrf.mxu1 }
 0x476   :  { %v2314_v23 = vsub.f32 0.0, %v2242_v19  ;;  %v2234_v24 = vadd.f32 %v4103_v52, %v2233_v20 }
 0x477   :  { %v3240_v26 = vpop.eup %3239  ;;  %v3029_v34 = vpop.f32.mrf.mxu1 }
 0x478   :  { %v3242_v27 = vpop.eup %3241  ;;  %2498 = vst [vmem:[#allocation15 + $0x50] sm:$0xff] %v3240_v26  ;;  %v2364_v28 = vmul.f32 1.442695, %v2314_v23  ;;  %v2312_v29 = vsub.f32 0.0, %v2234_v24  ;;  %v2245_v30 = vadd.f32 %v3029_v34, %v4103_v52 }
 0x479   :  { %v3244_v58 = vpop.eup %3243  ;;  %v2406_v31 = vadd.f32 1.0, %v3242_v27  ;;  %v2236_v33 = vpop.f32.mrf.mxu1 }
 0x47a   :  { %v3246_v35 = vpop.eup %3245  ;;  %2496 = vst [vmem:[#allocation15 + $0x40] sm:$0xff] %v3244_v58  ;;  %3255 = vpow2.f32 %v2364_v28  ;;  %v2360_v36 = vmul.f32 1.442695, %v2312_v29  ;;  %v2315_v39 = vsub.f32 0.0, %v2245_v30  ;;  %v2237_v57 = vadd.f32 %v4103_v52, %v2236_v33 }
 0x47b   :  { %v3248_v25 = vpop.eup %3247  ;;  %3257 = vrcp.f32 %v2406_v31  ;;  %v2404_v43 = vadd.f32 1.0, %v3246_v35 }
 0x47c   :  { %v3250_v44 = vpop.eup %3249  ;;  %2499 = vst [vmem:[#allocation15 + $0x58] sm:$0xff] %v3248_v25  ;;  %3259 = vpow2.f32 %v2360_v36  ;;  %v2366_v47 = vmul.f32 1.442695, %v2315_v39  ;;  %v2313_v48 = vsub.f32 0.0, %v2237_v57 }
 0x47d   :  { %v3252_v60 = vpop.eup %3251  ;;  %3261 = vrcp.f32 %v2404_v43  ;;  %v2407_v61 = vadd.f32 1.0, %v3250_v44 }
 0x47e   :  { %v3254_v62 = vpop.eup %3253  ;;  %2497 = vst [vmem:[#allocation15 + $0x48] sm:$0xff] %v3252_v60  ;;  %3263 = vpow2.f32 %v2366_v47  ;;  %v2362_v63 = vmul.f32 1.442695, %v2313_v48 }
 0x47f   :  { %3265 = vrcp.f32 %v2407_v61  ;;  %v2405_v49 = vadd.f32 1.0, %v3254_v62 }
 0x480   :  { %3267 = vpow2.f32 %v2362_v63 }
 0x481   :  { %3269 = vrcp.f32 %v2405_v49 }
 0x483   :  { %v3032_v50 = vpop.f32.mrf.mxu1 }
 0x484   :  { %v2258_v51 = vadd.f32 %v3032_v50, %v4103_v52 }
 0x485   :  { %v2249_v1 = vpop.f32.mrf.mxu1 }
 0x486   :  { %v2318_v2 = vsub.f32 0.0, %v2258_v51  ;;  %v2250_v3 = vadd.f32 %v4103_v52, %v2249_v1 }
 0x487   :  { %v3256_v4 = vpop.eup %3255  ;;  %v3033_v53 = vpop.f32.mrf.mxu1 }
 0x488   :  { %v3258_v32 = vpop.eup %3257  ;;  %v2410_v5 = vadd.f32 1.0, %v3256_v4  ;;  %v2372_v54 = vmul.f32 1.442695, %v2318_v2  ;;  %v2316_v40 = vsub.f32 0.0, %v2250_v3  ;;  %v2261_v6 = vadd.f32 %v3033_v53, %v4103_v52 }
 0x489   :  { %v3260_v55 = vpop.eup %3259  ;;  %2502 = vst [vmem:[#allocation15 + $0x70] sm:$0xff] %v3258_v32  ;;  %v2252_v7 = vpop.f32.mrf.mxu1 }
 0x48a   :  { %v3262_v8 = vpop.eup %3261  ;;  %3271 = vrcp.f32 %v2410_v5  ;;  %v2408_v9 = vadd.f32 1.0, %v3260_v55  ;;  %v2368_v10 = vmul.f32 1.442695, %v2316_v40  ;;  %v2319_v11 = vsub.f32 0.0, %v2261_v6 }
 0x48b   :  { %v3264_v12 = vpop.eup %3263  ;;  %2500 = vst [vmem:[#allocation15 + $0x60] sm:$0xff] %v3262_v8  ;;  %3273 = vpow2.f32 %v2372_v54  ;;  %v2253_v13 = vadd.f32 %v4103_v52, %v2252_v7 }
 0x48c   :  { %v3266_v14 = vpop.eup %3265  ;;  %3275 = vrcp.f32 %v2408_v9  ;;  %v2411_v15 = vadd.f32 1.0, %v3264_v12  ;;  %v2374_v16 = vmul.f32 1.442695, %v2319_v11 }
 0x48d   :  { %v3268_v21 = vpop.eup %3267  ;;  %2503 = vst [vmem:[#allocation15 + $0x78] sm:$0xff] %v3266_v14  ;;  %3277 = vpow2.f32 %v2368_v10  ;;  %v2317_v22 = vsub.f32 0.0, %v2253_v13 }
 0x48e   :  { %v3270_v37 = vpop.eup %3269  ;;  %3279 = vrcp.f32 %v2411_v15  ;;  %v2409_v38 = vadd.f32 1.0, %v3268_v21 }
 0x48f   :  { %2501 = vst [vmem:[#allocation15 + $0x68] sm:$0xff] %v3270_v37  ;;  %3281 = vpow2.f32 %v2374_v16  ;;  %v2370_v41 = vmul.f32 1.442695, %v2317_v22 }
 0x490   :  { %3283 = vrcp.f32 %v2409_v38 }
 0x491   :  { %3285 = vpow2.f32 %v2370_v41 }
 0x493   :  { %v3036_v42 = vpop.f32.mrf.mxu1 }
 0x494   :  { %v2274_v45 = vadd.f32 %v3036_v42, %v4103_v52 }
 0x495   :  { %v2265_v46 = vpop.f32.mrf.mxu1 }
 0x496   :  { %v2322_v56 = vsub.f32 0.0, %v2274_v45  ;;  %v2266_v59 = vadd.f32 %v4103_v52, %v2265_v46 }
 0x497   :  { %v3272_v0 = vpop.eup %3271  ;;  %v3037_v17 = vpop.f32.mrf.mxu1 }
 0x498   :  { %v3274_v18 = vpop.eup %3273  ;;  %2506 = vst [vmem:[#allocation15 + $0x90] sm:$0xff] %v3272_v0  ;;  %v2380_v19 = vmul.f32 1.442695, %v2322_v56  ;;  %v2320_v20 = vsub.f32 0.0, %v2266_v59  ;;  %v2277_v23 = vadd.f32 %v3037_v17, %v4103_v52 }
 0x499   :  { %v3276_v24 = vpop.eup %3275  ;;  %v2414_v26 = vadd.f32 1.0, %v3274_v18  ;;  %v2268_v34 = vpop.f32.mrf.mxu1 }
 0x49a   :  { %v3278_v27 = vpop.eup %3277  ;;  %2504 = vst [vmem:[#allocation15 + $0x80] sm:$0xff] %v3276_v24  ;;  %3287 = vpow2.f32 %v2380_v19  ;;  %v2376_v28 = vmul.f32 1.442695, %v2320_v20  ;;  %v2323_v29 = vsub.f32 0.0, %v2277_v23  ;;  %v2269_v30 = vadd.f32 %v4103_v52, %v2268_v34 }
 0x49b   :  { %v3280_v58 = vpop.eup %3279  ;;  %3289 = vrcp.f32 %v2414_v26  ;;  %v2412_v31 = vadd.f32 1.0, %v3278_v27 }
 0x49c   :  { %v3282_v33 = vpop.eup %3281  ;;  %2507 = vst [vmem:[#allocation15 + $0x98] sm:$0xff] %v3280_v58  ;;  %3291 = vpow2.f32 %v2376_v28  ;;  %v2382_v35 = vmul.f32 1.442695, %v2323_v29  ;;  %v2321_v36 = vsub.f32 0.0, %v2269_v30 }
 0x49d   :  { %v3284_v39 = vpop.eup %3283  ;;  %3293 = vrcp.f32 %v2412_v31  ;;  %v2415_v57 = vadd.f32 1.0, %v3282_v33 }
 0x49e   :  { %v3286_v25 = vpop.eup %3285  ;;  %2505 = vst [vmem:[#allocation15 + $0x88] sm:$0xff] %v3284_v39  ;;  %3295 = vpow2.f32 %v2382_v35  ;;  %v2378_v43 = vmul.f32 1.442695, %v2321_v36 }
 0x49f   :  { %3297 = vrcp.f32 %v2415_v57  ;;  %v2413_v44 = vadd.f32 1.0, %v3286_v25 }
 0x4a0   :  { %3299 = vpow2.f32 %v2378_v43 }
 0x4a1   :  { %3301 = vrcp.f32 %v2413_v44 }
 0x4a3   :  { %v3040_v47 = vpop.f32.mrf.mxu1 }
 0x4a4   :  { %v2290_v48 = vadd.f32 %v3040_v47, %v4103_v52 }
 0x4a5   :  { %v2281_v60 = vpop.f32.mrf.mxu1 }
 0x4a6   :  { %v2326_v61 = vsub.f32 0.0, %v2290_v48  ;;  %v2282_v62 = vadd.f32 %v4103_v52, %v2281_v60 }
 0x4a7   :  { %v3288_v63 = vpop.eup %3287  ;;  %v3041_v49 = vpop.f32.mrf.mxu1 }
 0x4a8   :  { %v3290_v50 = vpop.eup %3289  ;;  %v2418_v51 = vadd.f32 1.0, %v3288_v63  ;;  %v2388_v1 = vmul.f32 1.442695, %v2326_v61  ;;  %v2324_v2 = vsub.f32 0.0, %v2282_v62  ;;  %v2293_v3 = vadd.f32 %v3041_v49, %v4103_v52 }
 0x4a9   :  { %v3292_v4 = vpop.eup %3291  ;;  %2510 = vst [vmem:[#allocation15 + $0xb0] sm:$0xff] %v3290_v50  ;;  %v2284_v53 = vpop.f32.mrf.mxu1 }
 0x4aa   :  { %v3294_v32 = vpop.eup %3293  ;;  %3303 = vrcp.f32 %v2418_v51  ;;  %v2416_v5 = vadd.f32 1.0, %v3292_v4  ;;  %v2384_v54 = vmul.f32 1.442695, %v2324_v2  ;;  %v2327_v40 = vsub.f32 0.0, %v2293_v3 }
 0x4ab   :  { %v3296_v6 = vpop.eup %3295  ;;  %2508 = vst [vmem:[#allocation15 + $0xa0] sm:$0xff] %v3294_v32  ;;  %3305 = vpow2.f32 %v2388_v1  ;;  %v2285_v55 = vadd.f32 %v4103_v52, %v2284_v53 }
 0x4ac   :  { %v3298_v7 = vpop.eup %3297  ;;  %3307 = vrcp.f32 %v2416_v5  ;;  %v2419_v8 = vadd.f32 1.0, %v3296_v6  ;;  %v2390_v9 = vmul.f32 1.442695, %v2327_v40 }
 0x4ad   :  { %v3300_v10 = vpop.eup %3299  ;;  %2511 = vst [vmem:[#allocation15 + $0xb8] sm:$0xff] %v3298_v7  ;;  %3309 = vpow2.f32 %v2384_v54  ;;  %v2325_v11 = vsub.f32 0.0, %v2285_v55 }
 0x4ae   :  { %v3302_v12 = vpop.eup %3301  ;;  %3311 = vrcp.f32 %v2419_v8  ;;  %v2417_v13 = vadd.f32 1.0, %v3300_v10 }
 0x4af   :  { %2509 = vst [vmem:[#allocation15 + $0xa8] sm:$0xff] %v3302_v12  ;;  %3313 = vpow2.f32 %v2390_v9  ;;  %v2386_v14 = vmul.f32 1.442695, %v2325_v11 }
 0x4b0   :  { %3315 = vrcp.f32 %v2417_v13 }
 0x4b1   :  { %3317 = vpow2.f32 %v2386_v14 }
 0x4b7   :  { %v3304_v15 = vpop.eup %3303 }
 0x4b8   :  { %v3306_v16 = vpop.eup %3305  ;;  %2514 = vst [vmem:[#allocation15 + $0xd0] sm:$0xff] %v3304_v15 }
 0x4b9   :  { %v3308_v52 = vpop.eup %3307  ;;  %v2422_v21 = vadd.f32 1.0, %v3306_v16 }
 0x4ba   :  { %v3310_v22 = vpop.eup %3309  ;;  %2512 = vst [vmem:[#allocation15 + $0xc0] sm:$0xff] %v3308_v52 }
 0x4bb   :  { %v3312_v37 = vpop.eup %3311  ;;  %3319 = vrcp.f32 %v2422_v21  ;;  %v2420_v38 = vadd.f32 1.0, %v3310_v22 }
 0x4bc   :  { %v3314_v41 = vpop.eup %3313  ;;  %2515 = vst [vmem:[#allocation15 + $0xd8] sm:$0xff] %v3312_v37 }
 0x4bd   :  { %v3316_v42 = vpop.eup %3315  ;;  %3321 = vrcp.f32 %v2420_v38  ;;  %v2423_v45 = vadd.f32 1.0, %v3314_v41 }
 0x4be   :  { %v3318_v46 = vpop.eup %3317  ;;  %2513 = vst [vmem:[#allocation15 + $0xc8] sm:$0xff] %v3316_v42 }
 0x4bf   :  { %3323 = vrcp.f32 %v2423_v45  ;;  %v2421_v56 = vadd.f32 1.0, %v3318_v46 }
 0x4c1   :  { %3325 = vrcp.f32 %v2421_v56 }
 0x4c8   :  { %v3320_v59 = vpop.eup %3319 }
 0x4c9   :  { %2518 = vst [vmem:[#allocation15 + $0xf0] sm:$0xff] %v3320_v59 }
 0x4ca   :  { %v3322_v0 = vpop.eup %3321 }
 0x4cb   :  { %2516 = vst [vmem:[#allocation15 + $0xe0] sm:$0xff] %v3322_v0 }
 0x4cc   :  { %v3324_v17 = vpop.eup %3323 }
 0x4cd   :  { %2519 = vst [vmem:[#allocation15 + $0xf8] sm:$0xff] %v3324_v17 }
 0x4ce   :  { %v3326_v18 = vpop.eup %3325 }
 0x4cf   :  { %2517 = vst [vmem:[#allocation15 + $0xe8] sm:$0xff] %v3326_v18 }
 0x4d0   :  { %3499 = shalt.err (!%p3496_p2)
}
 0x4d1   :  { %2543 = dma.vmem_to_hbm [thread:$0]  %s2538_s18, 4096, %s4164_s15, [#allocation16], %s3526_s4, %s3526_s4, %s3527_s24  }
 0x4d2   :  { %3516 = dma.done.wait [#allocation4], 4096  }
 0x4d3   :  { %3517 = vsyncadd [#allocation4], 4294963200 }
 0x4d4   :  { %3518 = dma.done.wait [#allocation16], 4096  }
 0x4d5   :  { %3519 = vsyncadd [#allocation16], 4294963200 }
 0x4d6   :  { %2550 = vsyncpa [#allocation3], 1 }
 0x4d7   :  { %2551 = vsyncpa [#allocation6], 1 }
 0x4d8   :  { %2552 = vsyncpa [#allocation9], 1 }
 0x4d9   :  { %2553 = vsyncpa [#allocation12], 1 }
 0x4da   :  { %2554 = vsyncpa [#allocation4], 1 }
 0x4db   :  { %2555 = vsyncpa [#allocation16], 1 }

</bundles_post_ra>
